<compile_context>
chip_gen: v5e
topology: v5e:2x2
jax: 0.10.0
libtpu: 0.0.40
codegen_flags: <defaults>
</compile_context>

<pallas_src>
import functools

import jax
import jax.numpy as jnp
from jax import lax
from jax.experimental import pallas as pl
from jax.experimental.pallas import tpu as pltpu

BN_EPS = 1e-5
NUM_ANCHORS = 3
LANE = 128
NUM_CORE_SPLITS = 2      # pass-1 partial stats; maps onto v7x's 2 TCs


def _round_up(x, m):
    return ((x + m - 1) // m) * m


def _hw_config(k):
    """(vmem_limit_bytes, max_row_tile) tuned per TPU generation."""
    kind = ""
    try:
        kind = jax.devices()[0].device_kind.lower()
    except Exception:
        pass
    if "v5" in kind or "v6" in kind:
        # 128 MiB physical VMEM: large row tiles amortize per-grid-step overhead.
        return 96 * 1024 * 1024, 1024
    # v7x (64 MiB physical) / unknown: conservative; cap tiles for deep scales.
    return 32 * 1024 * 1024, (256 if k >= 2048 else 512)


def _choose_tiling(m, max_tile):
    """Pick a row tile (multiple of 8) with an even #tiles and minimal padding.

    Preferring a tile that exactly divides m avoids both the XLA-side zero-pad
    of the im2col rows and ragged-tile handling."""
    upper = min(max_tile, _round_up(m, 8))
    for tm in range(upper, 7, -8):
        if m % tm == 0 and (m // tm) % NUM_CORE_SPLITS == 0:
            return tm, m // tm, m
    tm = min(max_tile, _round_up(pl.cdiv(m, NUM_CORE_SPLITS), 8))
    num_tiles = _round_up(pl.cdiv(m, tm), NUM_CORE_SPLITS)
    return tm, num_tiles, num_tiles * tm


# ----------------------------------------------------------------------------
# Kernels
# ----------------------------------------------------------------------------
def _conv1_stats_kernel(x_ref, w1_ref, h_ref, sum_ref, sq_ref):
    """Pass 1: conv1 matmul, emit bf16 hidden tile + (8, C) per-core stat partials."""
    @pl.when(pl.program_id(1) == 0)
    def _init():
        sum_ref[...] = jnp.zeros_like(sum_ref)
        sq_ref[...] = jnp.zeros_like(sq_ref)

    h = jnp.dot(x_ref[...], w1_ref[...], preferred_element_type=jnp.float32)
    h_ref[...] = h.astype(jnp.bfloat16)               # consumed by pass 2 (no recompute)
    # Keep the partial column sums sublane-shaped (8, C): plain VPU adds per
    # tile; the cross-sublane 8 -> 1 collapse happens once, inside pass 2.
    hr = h.reshape(-1, 8, h.shape[-1])
    sum_ref[...] += jnp.sum(hr, axis=0)
    sq_ref[...] += jnp.sum(hr * hr, axis=0)


def _bn_act_conv2_kernel(inv_m, h_ref, sum_ref, sq_ref, gamma_ref, beta_ref,
                         w2_ref, b2_ref, o_ref):
    """Pass 2: fold BN stats, scale/shift + LeakyReLU, 1x1 conv + bias, bf16 out."""
    # Tiny (1, C) statistics fold, recomputed per tile: keeps the two
    # pallas_calls back-to-back (no intervening XLA fusion) and avoids any
    # cross-core scratch-initialization hazard under a "parallel" grid.
    csum = jnp.sum(sum_ref[...], axis=0, keepdims=True)
    csq = jnp.sum(sq_ref[...], axis=0, keepdims=True)
    mean = csum * inv_m
    # TODO(synk): E[x^2] - mean^2 can cancel catastrophically for very large m
    # with |mean| >> std; switch to mean-shifted / Welford merging if needed.
    var = jnp.maximum(csq * inv_m - mean * mean, 0.0)
    scale = gamma_ref[...] * lax.rsqrt(var + BN_EPS)
    shift = beta_ref[...] - mean * scale

    hn = h_ref[...].astype(jnp.float32) * scale + shift
    hn = jnp.maximum(hn, 0.1 * hn)                    # LeakyReLU(0.1): vmul + vmax
    y = jnp.dot(hn.astype(jnp.bfloat16), w2_ref[...],
                preferred_element_type=jnp.float32)
    o_ref[...] = (y + b2_ref[...]).astype(o_ref.dtype)


# ----------------------------------------------------------------------------
# Wrapper / glue
# ----------------------------------------------------------------------------
def _im2col_3x3(x_nhwc):
    """3x3, stride 1, pad 1 im2col. Feature order: (dy, dx, cin), cin fastest."""
    n, h, w, c = x_nhwc.shape
    xp = jnp.pad(x_nhwc, ((0, 0), (1, 1), (1, 1), (0, 0)))
    patches = [xp[:, dy:dy + h, dx:dx + w, :] for dy in range(3) for dx in range(3)]
    cols = jnp.concatenate(patches, axis=-1)          # (N, H, W, 9*C)
    return cols.reshape(n * h * w, 9 * c)
# TODO(synk): the im2col matrix is still materialized in HBM (9x input blow-up,
# now read only once, by pass 1).  Gathering the nine (dy, dx) views from a
# padded-NHWC VMEM slab inside pass 1 would cut conv1 input reads ~9x.


def _maybe_buffered_spec(shape, index_map, single_buffer):
    """BlockSpec for constant-index-map operands; single-buffered when supported."""
    if single_buffer:
        return pl.BlockSpec(shape, index_map, pipeline_mode=pl.Buffered(1))
    return pl.BlockSpec(shape, index_map)


@functools.partial(jax.jit, static_argnames=("num_classes", "single_buffer_weights"))
def scale_prediction(x_nchw, params, num_classes, single_buffer_weights=True):
    """One ScalePrediction forward.  x_nchw: (N, Cin, H, W) float32."""
    n, cin, h, w = x_nchw.shape
    c_hidden = 2 * cin
    num_outputs = num_classes + 5
    out_c = NUM_ANCHORS * num_outputs
    m = n * h * w
    k = 9 * cin

    c_hidden_p = _round_up(c_hidden, LANE)            # lane-dense hidden channels
    out_c_p = _round_up(out_c, LANE)                  # lane-dense output channels (128)

    vmem_limit, max_row_tile = _hw_config(k)
    tm, num_tiles, m_pad = _choose_tiling(m, max_row_tile)
    nth = num_tiles // NUM_CORE_SPLITS                # M tiles per core split

    # glue: NCHW -> NHWC (bf16) -> im2col rows; zero rows (if any padding) add
    # nothing to the BN sums since conv1 has no bias.
    x_nhwc = jnp.transpose(x_nchw, (0, 2, 3, 1)).astype(jnp.bfloat16)
    x_cols = _im2col_3x3(x_nhwc)                      # (m, 9*Cin) bf16
    if m_pad != m:
        x_cols = jnp.pad(x_cols, ((0, m_pad - m), (0, 0)))

    # conv1 weight (C_, Cin, 3, 3) -> (9*Cin, C_) bf16, zero-padded channels
    w1_mat = jnp.transpose(params["w1"], (2, 3, 1, 0)).reshape(k, c_hidden)
    w1_mat = jnp.pad(w1_mat, ((0, 0), (0, c_hidden_p - c_hidden))).astype(jnp.bfloat16)
    gamma = jnp.pad(params["gamma"], (0, c_hidden_p - c_hidden)).reshape(1, c_hidden_p)
    beta = jnp.pad(params["beta"], (0, c_hidden_p - c_hidden)).reshape(1, c_hidden_p)
    # conv2 weight (OUT, C_, 1, 1) -> (C_, OUT) bf16, zero-padded both ways
    w2_mat = jnp.transpose(params["w2"].reshape(out_c, c_hidden), (1, 0))
    w2_mat = jnp.pad(
        w2_mat, ((0, c_hidden_p - c_hidden), (0, out_c_p - out_c))).astype(jnp.bfloat16)
    b2 = jnp.pad(params["b2"], (0, out_c_p - out_c)).reshape(1, out_c_p)

    sb = single_buffer_weights
    stat_rows = 8 * NUM_CORE_SPLITS

    # --- pass 1: conv1 + hidden emission + streaming BN partial statistics ---
    row_spec = pl.BlockSpec((tm, k), lambda c, i: (c * nth + i, 0))
    h_out_spec = pl.BlockSpec((tm, c_hidden_p), lambda c, i: (c * nth + i, 0))
    stat_spec = pl.BlockSpec((8, c_hidden_p), lambda c, i: (c, 0))

    hidden, ch_sum, ch_sq = pl.pallas_call(
        _conv1_stats_kernel,
        out_shape=(
            jax.ShapeDtypeStruct((m_pad, c_hidden_p), jnp.bfloat16),
            jax.ShapeDtypeStruct((stat_rows, c_hidden_p), jnp.float32),
            jax.ShapeDtypeStruct((stat_rows, c_hidden_p), jnp.float32),
        ),
        grid=(NUM_CORE_SPLITS, nth),
        in_specs=[row_spec,
                  _maybe_buffered_spec((k, c_hidden_p), lambda c, i: (0, 0), sb)],
        out_specs=(h_out_spec, stat_spec, stat_spec),
        compiler_params=pltpu.CompilerParams(
            dimension_semantics=("parallel", "arbitrary"),
            vmem_limit_bytes=vmem_limit),
    )(x_cols, w1_mat)

    # --- pass 2: BN fold + LeakyReLU + 1x1 conv + bias (bf16 writeback) ------
    y = pl.pallas_call(
        functools.partial(_bn_act_conv2_kernel, 1.0 / m),
        out_shape=jax.ShapeDtypeStruct((m_pad, out_c_p), jnp.bfloat16),
        grid=(num_tiles,),
        in_specs=[pl.BlockSpec((tm, c_hidden_p), lambda i: (i, 0)),
                  _maybe_buffered_spec((stat_rows, c_hidden_p), lambda i: (0, 0), sb),
                  _maybe_buffered_spec((stat_rows, c_hidden_p), lambda i: (0, 0), sb),
                  _maybe_buffered_spec((1, c_hidden_p), lambda i: (0, 0), sb),
                  _maybe_buffered_spec((1, c_hidden_p), lambda i: (0, 0), sb),
                  _maybe_buffered_spec((c_hidden_p, out_c_p), lambda i: (0, 0), sb),
                  _maybe_buffered_spec((1, out_c_p), lambda i: (0, 0), sb)],
        out_specs=pl.BlockSpec((tm, out_c_p), lambda i: (i, 0)),
        compiler_params=pltpu.CompilerParams(
            dimension_semantics=("parallel",),
            vmem_limit_bytes=vmem_limit),
    )(hidden, ch_sum, ch_sq, gamma, beta, w2_mat, b2)

    # glue: strip padding, restore f32, (M, A*NO) -> (N, H, W, A, NO) -> (N, A, H, W, NO)
    # matches torch: pred.reshape(N, A, NO, H, W).permute(0, 1, 3, 4, 2)
    y = y[:m, :out_c].astype(jnp.float32).reshape(n, h, w, NUM_ANCHORS, num_outputs)
    return jnp.transpose(y, (0, 3, 1, 2, 4))


def detect_forward(layers, params_list, num_classes):
    # Scales have different channel counts -> one (jitted, tiled) call each.
    outs = []
    for x, p in zip(layers, params_list):
        try:
            o = scale_prediction(x, p, num_classes=num_classes,
                                 single_buffer_weights=True)
            o = jax.block_until_ready(o)
        except Exception:
            # pipeline_mode=pl.Buffered(1) support varies across jax versions;
            # fall back to default double-buffered weight blocks.
            o = scale_prediction(x, p, num_classes=num_classes,
                                 single_buffer_weights=False)
        outs.append(o)
    return outs


# ----------------------------------------------------------------------------
# Parameters + pure-JAX reference (mirrors the kernel's bf16/f32 quantization)
# ----------------------------------------------------------------------------
def _init_scale_params(key, cin, num_classes):
    c_hidden = 2 * cin
    out_c = NUM_ANCHORS * (num_classes + 5)
    k1, k2, k3, k4, k5 = jax.random.split(key, 5)
    return {
        "w1": 0.05 * jax.random.normal(k1, (c_hidden, cin, 3, 3), jnp.float32),
        "gamma": 1.0 + 0.1 * jax.random.normal(k2, (c_hidden,), jnp.float32),
        "beta": 0.1 * jax.random.normal(k3, (c_hidden,), jnp.float32),
        "w2": 0.05 * jax.random.normal(k4, (out_c, c_hidden, 1, 1), jnp.float32),
        "b2": 0.1 * jax.random.normal(k5, (out_c,), jnp.float32),
    }


def _reference_scale(x_nchw, params, num_classes):
    """Pure-JAX reference with the same quantization points as the kernel path."""
    n, cin, h, w = x_nchw.shape
    c_hidden = 2 * cin
    num_outputs = num_classes + 5
    out_c = NUM_ANCHORS * num_outputs
    x_cols = _im2col_3x3(jnp.transpose(x_nchw, (0, 2, 3, 1)).astype(jnp.bfloat16))
    w1_mat = jnp.transpose(params["w1"], (2, 3, 1, 0)).reshape(9 * cin, c_hidden)
    hidden = jnp.dot(x_cols, w1_mat.astype(jnp.bfloat16),
                     preferred_element_type=jnp.float32)
    mean = hidden.mean(0, keepdims=True)
    var = jnp.maximum((hidden * hidden).mean(0, keepdims=True) - mean * mean, 0.0)
    scale = params["gamma"][None, :] * lax.rsqrt(var + BN_EPS)
    shift = params["beta"][None, :] - mean * scale
    # hidden is stored bf16 between the two kernels; BN applied as scale/shift
    hidden = hidden.astype(jnp.bfloat16).astype(jnp.float32) * scale + shift
    hidden = jnp.maximum(hidden, 0.1 * hidden)
    w2_mat = jnp.transpose(params["w2"].reshape(out_c, c_hidden), (1, 0))
    y = jnp.dot(hidden.astype(jnp.bfloat16), w2_mat.astype(jnp.bfloat16),
                preferred_element_type=jnp.float32) + params["b2"][None, :]
    y = y.astype(jnp.bfloat16).astype(jnp.float32)    # kernel writes bf16 output
    y = y.reshape(n, h, w, NUM_ANCHORS, num_outputs)
    return jnp.transpose(y, (0, 3, 1, 2, 4))


if __name__ == "__main__":
    num_classes = 4
    in_channels = (8, 16)          # two detection scales
    spatial = (8, 4)               # H = W per scale
    batch = 2

    key = jax.random.PRNGKey(0)
    k_in, k_par = jax.random.split(key)

    layers = []
    for cin, s in zip(in_channels, spatial):
        k_in, sub = jax.random.split(k_in)
        layers.append(jax.random.normal(sub, (batch, cin, s, s), jnp.float32))

    params_list = []
    for cin in in_channels:
        k_par, sub = jax.random.split(k_par)
        params_list.append(_init_scale_params(sub, cin, num_classes))

    outs = detect_forward(layers, params_list, num_classes)
    outs = jax.block_until_ready(outs)

    # shape + numeric sanity check vs pure-JAX reference
    ok = True
    for x, p, o in zip(layers, params_list, outs):
        n, cin, hh, ww = x.shape
        expected_shape = (n, NUM_ANCHORS, hh, ww, num_classes + 5)
        ref = _reference_scale(x, p, num_classes)
        if o.shape != expected_shape:
            ok = False
        if not jnp.allclose(o, ref, atol=5e-3, rtol=2e-2):
            ok = False

    print("KERNEL_OK" if ok else "KERNEL_MISMATCH")
</pallas_src>

<mosaic_0001>
module attributes {stable_mosaic.version = 11 : i64} {
  func.func @_conv1_stats_kernel(%arg0: i32, %arg1: i32, %arg2: memref<64x72xbf16, #tpu.memory_space<vmem>>, %arg3: memref<72x128xbf16, #tpu.memory_space<vmem>>, %arg4: memref<64x128xbf16, #tpu.memory_space<vmem>>, %arg5: memref<8x128xf32, #tpu.memory_space<vmem>>, %arg6: memref<8x128xf32, #tpu.memory_space<vmem>>) attributes {dimension_semantics = [#tpu.dimension_semantics<parallel>, #tpu.dimension_semantics<arbitrary>], iteration_bounds = array<i64: 2, 1>, scalar_prefetch = 0 : i64, scratch_operands = 0 : i64, tpu.core_type = #tpu.core_type<tc>, window_params = [{transform_indices = @transform_0, window_bounds = array<i64: 64, 72>}, {pipeline_mode = #tpu.pipeline_mode<synchronous>, transform_indices = @transform_1, window_bounds = array<i64: 72, 128>}, {transform_indices = @transform_2, window_bounds = array<i64: 64, 128>}, {transform_indices = @transform_3, window_bounds = array<i64: 8, 128>}, {transform_indices = @transform_4, window_bounds = array<i64: 8, 128>}]} {
    %c0_i32 = arith.constant 0 : i32
    %0 = arith.cmpi eq, %arg1, %c0_i32 : i32
    %1 = arith.extui %0 : i1 to i32
    %c0_i32_0 = arith.constant 0 : i32
    %2 = arith.cmpi ne, %1, %c0_i32_0 : i32
    scf.if %2 {
      %cst_16 = arith.constant 0.000000e+00 : f32
      %18 = vector.broadcast %cst_16 : f32 to vector<8x128xf32>
      %c0_17 = arith.constant 0 : index
      %c0_18 = arith.constant 0 : index
      %19 = vector.load %arg5[%c0_17, %c0_18] : memref<8x128xf32, #tpu.memory_space<vmem>>, vector<8x128xf32>
      tpu.vector_store %arg5[%c0_17, %c0_18], %18 {strides = array<i32>} : memref<8x128xf32, #tpu.memory_space<vmem>>, vector<8x128xf32>,
      %cst_19 = arith.constant 0.000000e+00 : f32
      %20 = vector.broadcast %cst_19 : f32 to vector<8x128xf32>
      %c0_20 = arith.constant 0 : index
      %c0_21 = arith.constant 0 : index
      %21 = vector.load %arg6[%c0_20, %c0_21] : memref<8x128xf32, #tpu.memory_space<vmem>>, vector<8x128xf32>
      tpu.vector_store %arg6[%c0_20, %c0_21], %20 {strides = array<i32>} : memref<8x128xf32, #tpu.memory_space<vmem>>, vector<8x128xf32>,
    } else {
    }
    %c0 = arith.constant 0 : index
    %c0_1 = arith.constant 0 : index
    %3 = vector.load %arg2[%c0, %c0_1] : memref<64x72xbf16, #tpu.memory_space<vmem>>, vector<64x72xbf16>
    %c0_2 = arith.constant 0 : index
    %c0_3 = arith.constant 0 : index
    %4 = vector.load %arg3[%c0_2, %c0_3] : memref<72x128xbf16, #tpu.memory_space<vmem>>, vector<72x128xbf16>
    %cst = arith.constant dense<0.000000e+00> : vector<64x128xf32>
    %5 = tpu.matmul %3, %4, %cst {dimension_numbers = #tpu.dot_dimension_numbers<[1], [0], [0], [1], [0, 0, 1, 1], [], []>} : vector<64x72xbf16>, vector<72x128xbf16>, vector<64x128xf32> -> vector<64x128xf32>
    %6 = arith.truncf %5 : vector<64x128xf32> to vector<64x128xbf16>
    %c0_4 = arith.constant 0 : index
    %c0_5 = arith.constant 0 : index
    %7 = vector.load %arg4[%c0_4, %c0_5] : memref<64x128xbf16, #tpu.memory_space<vmem>>, vector<64x128xbf16>
    tpu.vector_store %arg4[%c0_4, %c0_5], %6 {strides = array<i32>} : memref<64x128xbf16, #tpu.memory_space<vmem>>, vector<64x128xbf16>,
    %8 = vector.shape_cast %5 : vector<64x128xf32> to vector<8x8x128xf32>
    %c0_6 = arith.constant 0 : index
    %c0_7 = arith.constant 0 : index
    %9 = vector.load %arg5[%c0_6, %c0_7] : memref<8x128xf32, #tpu.memory_space<vmem>>, vector<8x128xf32>
    %cst_8 = arith.constant dense<0.000000e+00> : vector<8x128xf32>
    %10 = vector.multi_reduction <add>, %8, %cst_8 [0] : vector<8x8x128xf32> to vector<8x128xf32>
    %11 = arith.addf %9, %10 : vector<8x128xf32>
    %c0_9 = arith.constant 0 : index
    %c0_10 = arith.constant 0 : index
    %12 = vector.load %arg5[%c0_9, %c0_10] : memref<8x128xf32, #tpu.memory_space<vmem>>, vector<8x128xf32>
    tpu.vector_store %arg5[%c0_9, %c0_10], %11 {strides = array<i32>} : memref<8x128xf32, #tpu.memory_space<vmem>>, vector<8x128xf32>,
    %c0_11 = arith.constant 0 : index
    %c0_12 = arith.constant 0 : index
    %13 = vector.load %arg6[%c0_11, %c0_12] : memref<8x128xf32, #tpu.memory_space<vmem>>, vector<8x128xf32>
    %14 = arith.mulf %8, %8 : vector<8x8x128xf32>
    %cst_13 = arith.constant dense<0.000000e+00> : vector<8x128xf32>
    %15 = vector.multi_reduction <add>, %14, %cst_13 [0] : vector<8x8x128xf32> to vector<8x128xf32>
    %16 = arith.addf %13, %15 : vector<8x128xf32>
    %c0_14 = arith.constant 0 : index
    %c0_15 = arith.constant 0 : index
    %17 = vector.load %arg6[%c0_14, %c0_15] : memref<8x128xf32, #tpu.memory_space<vmem>>, vector<8x128xf32>
    tpu.vector_store %arg6[%c0_14, %c0_15], %16 {strides = array<i32>} : memref<8x128xf32, #tpu.memory_space<vmem>>, vector<8x128xf32>,
    return
  }
  func.func @transform_0(%arg0: i32, %arg1: i32) -> (i32, i32) {
    %c1_i32 = arith.constant 1 : i32
    %0 = arith.muli %arg0, %c1_i32 : i32
    %1 = arith.addi %0, %arg1 : i32
    %c0_i32 = arith.constant 0 : i32
    %c0_i32_0 = arith.constant 0 : i32
    return %1, %c0_i32 : i32, i32
  }
  func.func @transform_1(%arg0: i32, %arg1: i32) -> (i32, i32) {
    %c0_i32 = arith.constant 0 : i32
    %c0_i32_0 = arith.constant 0 : i32
    %c0_i32_1 = arith.constant 0 : i32
    return %c0_i32, %c0_i32_0 : i32, i32
  }
  func.func @transform_2(%arg0: i32, %arg1: i32) -> (i32, i32) {
    %c1_i32 = arith.constant 1 : i32
    %0 = arith.muli %arg0, %c1_i32 : i32
    %1 = arith.addi %0, %arg1 : i32
    %c0_i32 = arith.constant 0 : i32
    %c0_i32_0 = arith.constant 0 : i32
    return %1, %c0_i32 : i32, i32
  }
  func.func @transform_3(%arg0: i32, %arg1: i32) -> (i32, i32) {
    %c0_i32 = arith.constant 0 : i32
    %c0_i32_0 = arith.constant 0 : i32
    return %arg0, %c0_i32 : i32, i32
  }
  func.func @transform_4(%arg0: i32, %arg1: i32) -> (i32, i32) {
    %c0_i32 = arith.constant 0 : i32
    %c0_i32_0 = arith.constant 0 : i32
    return %arg0, %c0_i32 : i32, i32
  }
}

module attributes {stable_mosaic.version = 11 : i64} {
  func.func @_bn_act_conv2_kernel(%arg0: i32, %arg1: memref<64x128xbf16, #tpu.memory_space<vmem>>, %arg2: memref<16x128xf32, #tpu.memory_space<vmem>>, %arg3: memref<16x128xf32, #tpu.memory_space<vmem>>, %arg4: memref<1x128xf32, #tpu.memory_space<vmem>>, %arg5: memref<1x128xf32, #tpu.memory_space<vmem>>, %arg6: memref<128x128xbf16, #tpu.memory_space<vmem>>, %arg7: memref<1x128xf32, #tpu.memory_space<vmem>>, %arg8: memref<64x128xbf16, #tpu.memory_space<vmem>>) attributes {dimension_semantics = [#tpu.dimension_semantics<parallel>], iteration_bounds = array<i64: 2>, scalar_prefetch = 0 : i64, scratch_operands = 0 : i64, tpu.core_type = #tpu.core_type<tc>, window_params = [{transform_indices = @transform_0, window_bounds = array<i64: 64, 128>}, {pipeline_mode = #tpu.pipeline_mode<synchronous>, transform_indices = @transform_1, window_bounds = array<i64: 16, 128>}, {pipeline_mode = #tpu.pipeline_mode<synchronous>, transform_indices = @transform_2, window_bounds = array<i64: 16, 128>}, {pipeline_mode = #tpu.pipeline_mode<synchronous>, transform_indices = @transform_3, window_bounds = array<i64: 1, 128>}, {pipeline_mode = #tpu.pipeline_mode<synchronous>, transform_indices = @transform_4, window_bounds = array<i64: 1, 128>}, {pipeline_mode = #tpu.pipeline_mode<synchronous>, transform_indices = @transform_5, window_bounds = array<i64: 128, 128>}, {pipeline_mode = #tpu.pipeline_mode<synchronous>, transform_indices = @transform_6, window_bounds = array<i64: 1, 128>}, {transform_indices = @transform_7, window_bounds = array<i64: 64, 128>}]} {
    %c0 = arith.constant 0 : index
    %c0_0 = arith.constant 0 : index
    %0 = vector.load %arg2[%c0, %c0_0] : memref<16x128xf32, #tpu.memory_space<vmem>>, vector<16x128xf32>
    %cst = arith.constant dense<0.000000e+00> : vector<128xf32>
    %1 = vector.multi_reduction <add>, %0, %cst [0] : vector<16x128xf32> to vector<128xf32>
    %2 = vector.shape_cast %1 : vector<128xf32> to vector<1x128xf32>
    %c0_1 = arith.constant 0 : index
    %c0_2 = arith.constant 0 : index
    %3 = vector.load %arg3[%c0_1, %c0_2] : memref<16x128xf32, #tpu.memory_space<vmem>>, vector<16x128xf32>
    %cst_3 = arith.constant dense<0.000000e+00> : vector<128xf32>
    %4 = vector.multi_reduction <add>, %3, %cst_3 [0] : vector<16x128xf32> to vector<128xf32>
    %5 = vector.shape_cast %4 : vector<128xf32> to vector<1x128xf32>
    %cst_4 = arith.constant 7.812500e-03 : f32
    %6 = vector.broadcast %cst_4 : f32 to vector<1x128xf32>
    %7 = arith.mulf %2, %6 : vector<1x128xf32>
    %cst_5 = arith.constant 7.812500e-03 : f32
    %8 = vector.broadcast %cst_5 : f32 to vector<1x128xf32>
    %9 = arith.mulf %5, %8 : vector<1x128xf32>
    %10 = arith.mulf %7, %7 : vector<1x128xf32>
    %11 = arith.subf %9, %10 : vector<1x128xf32>
    %cst_6 = arith.constant 0.000000e+00 : f32
    %12 = vector.broadcast %cst_6 : f32 to vector<1x128xf32>
    %13 = arith.maximumf %11, %12 : vector<1x128xf32>
    %c0_7 = arith.constant 0 : index
    %c0_8 = arith.constant 0 : index
    %14 = vector.load %arg4[%c0_7, %c0_8] : memref<1x128xf32, #tpu.memory_space<vmem>>, vector<1x128xf32>
    %cst_9 = arith.constant 9.99999974E-6 : f32
    %15 = vector.broadcast %cst_9 : f32 to vector<1x128xf32>
    %16 = arith.addf %13, %15 : vector<1x128xf32>
    %17 = math.rsqrt %16 : vector<1x128xf32>
    %18 = arith.mulf %14, %17 : vector<1x128xf32>
    %c0_10 = arith.constant 0 : index
    %c0_11 = arith.constant 0 : index
    %19 = vector.load %arg5[%c0_10, %c0_11] : memref<1x128xf32, #tpu.memory_space<vmem>>, vector<1x128xf32>
    %20 = arith.mulf %7, %18 : vector<1x128xf32>
    %21 = arith.subf %19, %20 : vector<1x128xf32>
    %c0_12 = arith.constant 0 : index
    %c0_13 = arith.constant 0 : index
    %22 = vector.load %arg1[%c0_12, %c0_13] : memref<64x128xbf16, #tpu.memory_space<vmem>>, vector<64x128xbf16>
    %23 = arith.extf %22 : vector<64x128xbf16> to vector<64x128xf32>
    %24 = vector.broadcast %18 : vector<1x128xf32> to vector<64x128xf32>
    %25 = arith.mulf %23, %24 : vector<64x128xf32>
    %26 = vector.broadcast %21 : vector<1x128xf32> to vector<64x128xf32>
    %27 = arith.addf %25, %26 : vector<64x128xf32>
    %cst_14 = arith.constant 1.000000e-01 : f32
    %28 = vector.broadcast %cst_14 : f32 to vector<64x128xf32>
    %29 = arith.mulf %28, %27 : vector<64x128xf32>
    %30 = arith.maximumf %27, %29 : vector<64x128xf32>
    %31 = arith.truncf %30 : vector<64x128xf32> to vector<64x128xbf16>
    %c0_15 = arith.constant 0 : index
    %c0_16 = arith.constant 0 : index
    %32 = vector.load %arg6[%c0_15, %c0_16] : memref<128x128xbf16, #tpu.memory_space<vmem>>, vector<128x128xbf16>
    %cst_17 = arith.constant dense<0.000000e+00> : vector<64x128xf32>
    %33 = tpu.matmul %31, %32, %cst_17 {dimension_numbers = #tpu.dot_dimension_numbers<[1], [0], [0], [1], [0, 0, 1, 1], [], []>} : vector<64x128xbf16>, vector<128x128xbf16>, vector<64x128xf32> -> vector<64x128xf32>
    %c0_18 = arith.constant 0 : index
    %c0_19 = arith.constant 0 : index
    %34 = vector.load %arg7[%c0_18, %c0_19] : memref<1x128xf32, #tpu.memory_space<vmem>>, vector<1x128xf32>
    %35 = vector.broadcast %34 : vector<1x128xf32> to vector<64x128xf32>
    %36 = arith.addf %33, %35 : vector<64x128xf32>
    %37 = arith.truncf %36 : vector<64x128xf32> to vector<64x128xbf16>
    %c0_20 = arith.constant 0 : index
    %c0_21 = arith.constant 0 : index
    %38 = vector.load %arg8[%c0_20, %c0_21] : memref<64x128xbf16, #tpu.memory_space<vmem>>, vector<64x128xbf16>
    tpu.vector_store %arg8[%c0_20, %c0_21], %37 {strides = array<i32>} : memref<64x128xbf16, #tpu.memory_space<vmem>>, vector<64x128xbf16>,
    return
  }
  func.func @transform_0(%arg0: i32) -> (i32, i32) {
    %c0_i32 = arith.constant 0 : i32
    %c0_i32_0 = arith.constant 0 : i32
    return %arg0, %c0_i32 : i32, i32
  }
  func.func @transform_1(%arg0: i32) -> (i32, i32) {
    %c0_i32 = arith.constant 0 : i32
    %c0_i32_0 = arith.constant 0 : i32
    %c0_i32_1 = arith.constant 0 : i32
    return %c0_i32, %c0_i32_0 : i32, i32
  }
  func.func @transform_2(%arg0: i32) -> (i32, i32) {
    %c0_i32 = arith.constant 0 : i32
    %c0_i32_0 = arith.constant 0 : i32
    %c0_i32_1 = arith.constant 0 : i32
    return %c0_i32, %c0_i32_0 : i32, i32
  }
  func.func @transform_3(%arg0: i32) -> (i32, i32) {
    %c0_i32 = arith.constant 0 : i32
    %c0_i32_0 = arith.constant 0 : i32
    %c0_i32_1 = arith.constant 0 : i32
    return %c0_i32, %c0_i32_0 : i32, i32
  }
  func.func @transform_4(%arg0: i32) -> (i32, i32) {
    %c0_i32 = arith.constant 0 : i32
    %c0_i32_0 = arith.constant 0 : i32
    %c0_i32_1 = arith.constant 0 : i32
    return %c0_i32, %c0_i32_0 : i32, i32
  }
  func.func @transform_5(%arg0: i32) -> (i32, i32) {
    %c0_i32 = arith.constant 0 : i32
    %c0_i32_0 = arith.constant 0 : i32
    %c0_i32_1 = arith.constant 0 : i32
    return %c0_i32, %c0_i32_0 : i32, i32
  }
  func.func @transform_6(%arg0: i32) -> (i32, i32) {
    %c0_i32 = arith.constant 0 : i32
    %c0_i32_0 = arith.constant 0 : i32
    %c0_i32_1 = arith.constant 0 : i32
    return %c0_i32, %c0_i32_0 : i32, i32
  }
  func.func @transform_7(%arg0: i32) -> (i32, i32) {
    %c0_i32 = arith.constant 0 : i32
    %c0_i32_0 = arith.constant 0 : i32
    return %arg0, %c0_i32 : i32, i32
  }
}

module attributes {stable_mosaic.version = 11 : i64} {
  func.func @_conv1_stats_kernel(%arg0: i32, %arg1: i32, %arg2: memref<64x72xbf16, #tpu.memory_space<vmem>>, %arg3: memref<72x128xbf16, #tpu.memory_space<vmem>>, %arg4: memref<64x128xbf16, #tpu.memory_space<vmem>>, %arg5: memref<8x128xf32, #tpu.memory_space<vmem>>, %arg6: memref<8x128xf32, #tpu.memory_space<vmem>>) attributes {dimension_semantics = [#tpu.dimension_semantics<parallel>, #tpu.dimension_semantics<arbitrary>], iteration_bounds = array<i64: 2, 1>, scalar_prefetch = 0 : i64, scratch_operands = 0 : i64, tpu.core_type = #tpu.core_type<tc>, window_params = [{transform_indices = @transform_0, window_bounds = array<i64: 64, 72>}, {pipeline_mode = #tpu.pipeline_mode<synchronous>, transform_indices = @transform_1, window_bounds = array<i64: 72, 128>}, {transform_indices = @transform_2, window_bounds = array<i64: 64, 128>}, {transform_indices = @transform_3, window_bounds = array<i64: 8, 128>}, {transform_indices = @transform_4, window_bounds = array<i64: 8, 128>}]} {
    %c0_i32 = arith.constant 0 : i32
    %0 = arith.cmpi eq, %arg1, %c0_i32 : i32
    %1 = arith.extui %0 : i1 to i32
    %c0_i32_0 = arith.constant 0 : i32
    %2 = arith.cmpi ne, %1, %c0_i32_0 : i32
    scf.if %2 {
      %cst_16 = arith.constant 0.000000e+00 : f32
      %18 = vector.broadcast %cst_16 : f32 to vector<8x128xf32>
      %c0_17 = arith.constant 0 : index
      %c0_18 = arith.constant 0 : index
      %19 = vector.load %arg5[%c0_17, %c0_18] : memref<8x128xf32, #tpu.memory_space<vmem>>, vector<8x128xf32>
      tpu.vector_store %arg5[%c0_17, %c0_18], %18 {strides = array<i32>} : memref<8x128xf32, #tpu.memory_space<vmem>>, vector<8x128xf32>,
      %cst_19 = arith.constant 0.000000e+00 : f32
      %20 = vector.broadcast %cst_19 : f32 to vector<8x128xf32>
      %c0_20 = arith.constant 0 : index
      %c0_21 = arith.constant 0 : index
      %21 = vector.load %arg6[%c0_20, %c0_21] : memref<8x128xf32, #tpu.memory_space<vmem>>, vector<8x128xf32>
      tpu.vector_store %arg6[%c0_20, %c0_21], %20 {strides = array<i32>} : memref<8x128xf32, #tpu.memory_space<vmem>>, vector<8x128xf32>,
    } else {
    }
    %c0 = arith.constant 0 : index
    %c0_1 = arith.constant 0 : index
    %3 = vector.load %arg2[%c0, %c0_1] : memref<64x72xbf16, #tpu.memory_space<vmem>>, vector<64x72xbf16>
    %c0_2 = arith.constant 0 : index
    %c0_3 = arith.constant 0 : index
    %4 = vector.load %arg3[%c0_2, %c0_3] : memref<72x128xbf16, #tpu.memory_space<vmem>>, vector<72x128xbf16>
    %cst = arith.constant dense<0.000000e+00> : vector<64x128xf32>
    %5 = tpu.matmul %3, %4, %cst {dimension_numbers = #tpu.dot_dimension_numbers<[1], [0], [0], [1], [0, 0, 1, 1], [], []>} : vector<64x72xbf16>, vector<72x128xbf16>, vector<64x128xf32> -> vector<64x128xf32>
    %6 = arith.truncf %5 : vector<64x128xf32> to vector<64x128xbf16>
    %c0_4 = arith.constant 0 : index
    %c0_5 = arith.constant 0 : index
    %7 = vector.load %arg4[%c0_4, %c0_5] : memref<64x128xbf16, #tpu.memory_space<vmem>>, vector<64x128xbf16>
    tpu.vector_store %arg4[%c0_4, %c0_5], %6 {strides = array<i32>} : memref<64x128xbf16, #tpu.memory_space<vmem>>, vector<64x128xbf16>,
    %8 = vector.shape_cast %5 : vector<64x128xf32> to vector<8x8x128xf32>
    %c0_6 = arith.constant 0 : index
    %c0_7 = arith.constant 0 : index
    %9 = vector.load %arg5[%c0_6, %c0_7] : memref<8x128xf32, #tpu.memory_space<vmem>>, vector<8x128xf32>
    %cst_8 = arith.constant dense<0.000000e+00> : vector<8x128xf32>
    %10 = vector.multi_reduction <add>, %8, %cst_8 [0] : vector<8x8x128xf32> to vector<8x128xf32>
    %11 = arith.addf %9, %10 : vector<8x128xf32>
    %c0_9 = arith.constant 0 : index
    %c0_10 = arith.constant 0 : index
    %12 = vector.load %arg5[%c0_9, %c0_10] : memref<8x128xf32, #tpu.memory_space<vmem>>, vector<8x128xf32>
    tpu.vector_store %arg5[%c0_9, %c0_10], %11 {strides = array<i32>} : memref<8x128xf32, #tpu.memory_space<vmem>>, vector<8x128xf32>,
    %c0_11 = arith.constant 0 : index
    %c0_12 = arith.constant 0 : index
    %13 = vector.load %arg6[%c0_11, %c0_12] : memref<8x128xf32, #tpu.memory_space<vmem>>, vector<8x128xf32>
    %14 = arith.mulf %8, %8 : vector<8x8x128xf32>
    %cst_13 = arith.constant dense<0.000000e+00> : vector<8x128xf32>
    %15 = vector.multi_reduction <add>, %14, %cst_13 [0] : vector<8x8x128xf32> to vector<8x128xf32>
    %16 = arith.addf %13, %15 : vector<8x128xf32>
    %c0_14 = arith.constant 0 : index
    %c0_15 = arith.constant 0 : index
    %17 = vector.load %arg6[%c0_14, %c0_15] : memref<8x128xf32, #tpu.memory_space<vmem>>, vector<8x128xf32>
    tpu.vector_store %arg6[%c0_14, %c0_15], %16 {strides = array<i32>} : memref<8x128xf32, #tpu.memory_space<vmem>>, vector<8x128xf32>,
    return
  }
  func.func @transform_0(%arg0: i32, %arg1: i32) -> (i32, i32) {
    %c1_i32 = arith.constant 1 : i32
    %0 = arith.muli %arg0, %c1_i32 : i32
    %1 = arith.addi %0, %arg1 : i32
    %c0_i32 = arith.constant 0 : i32
    %c0_i32_0 = arith.constant 0 : i32
    return %1, %c0_i32 : i32, i32
  }
  func.func @transform_1(%arg0: i32, %arg1: i32) -> (i32, i32) {
    %c0_i32 = arith.constant 0 : i32
    %c0_i32_0 = arith.constant 0 : i32
    %c0_i32_1 = arith.constant 0 : i32
    return %c0_i32, %c0_i32_0 : i32, i32
  }
  func.func @transform_2(%arg0: i32, %arg1: i32) -> (i32, i32) {
    %c1_i32 = arith.constant 1 : i32
    %0 = arith.muli %arg0, %c1_i32 : i32
    %1 = arith.addi %0, %arg1 : i32
    %c0_i32 = arith.constant 0 : i32
    %c0_i32_0 = arith.constant 0 : i32
    return %1, %c0_i32 : i32, i32
  }
  func.func @transform_3(%arg0: i32, %arg1: i32) -> (i32, i32) {
    %c0_i32 = arith.constant 0 : i32
    %c0_i32_0 = arith.constant 0 : i32
    return %arg0, %c0_i32 : i32, i32
  }
  func.func @transform_4(%arg0: i32, %arg1: i32) -> (i32, i32) {
    %c0_i32 = arith.constant 0 : i32
    %c0_i32_0 = arith.constant 0 : i32
    return %arg0, %c0_i32 : i32, i32
  }
}

module attributes {stable_mosaic.version = 11 : i64} {
  func.func @_bn_act_conv2_kernel(%arg0: i32, %arg1: memref<64x128xbf16, #tpu.memory_space<vmem>>, %arg2: memref<16x128xf32, #tpu.memory_space<vmem>>, %arg3: memref<16x128xf32, #tpu.memory_space<vmem>>, %arg4: memref<1x128xf32, #tpu.memory_space<vmem>>, %arg5: memref<1x128xf32, #tpu.memory_space<vmem>>, %arg6: memref<128x128xbf16, #tpu.memory_space<vmem>>, %arg7: memref<1x128xf32, #tpu.memory_space<vmem>>, %arg8: memref<64x128xbf16, #tpu.memory_space<vmem>>) attributes {dimension_semantics = [#tpu.dimension_semantics<parallel>], iteration_bounds = array<i64: 2>, scalar_prefetch = 0 : i64, scratch_operands = 0 : i64, tpu.core_type = #tpu.core_type<tc>, window_params = [{transform_indices = @transform_0, window_bounds = array<i64: 64, 128>}, {pipeline_mode = #tpu.pipeline_mode<synchronous>, transform_indices = @transform_1, window_bounds = array<i64: 16, 128>}, {pipeline_mode = #tpu.pipeline_mode<synchronous>, transform_indices = @transform_2, window_bounds = array<i64: 16, 128>}, {pipeline_mode = #tpu.pipeline_mode<synchronous>, transform_indices = @transform_3, window_bounds = array<i64: 1, 128>}, {pipeline_mode = #tpu.pipeline_mode<synchronous>, transform_indices = @transform_4, window_bounds = array<i64: 1, 128>}, {pipeline_mode = #tpu.pipeline_mode<synchronous>, transform_indices = @transform_5, window_bounds = array<i64: 128, 128>}, {pipeline_mode = #tpu.pipeline_mode<synchronous>, transform_indices = @transform_6, window_bounds = array<i64: 1, 128>}, {transform_indices = @transform_7, window_bounds = array<i64: 64, 128>}]} {
    %c0 = arith.constant 0 : index
    %c0_0 = arith.constant 0 : index
    %0 = vector.load %arg2[%c0, %c0_0] : memref<16x128xf32, #tpu.memory_space<vmem>>, vector<16x128xf32>
    %cst = arith.constant dense<0.000000e+00> : vector<128xf32>
    %1 = vector.multi_reduction <add>, %0, %cst [0] : vector<16x128xf32> to vector<128xf32>
    %2 = vector.shape_cast %1 : vector<128xf32> to vector<1x128xf32>
    %c0_1 = arith.constant 0 : index
    %c0_2 = arith.constant 0 : index
    %3 = vector.load %arg3[%c0_1, %c0_2] : memref<16x128xf32, #tpu.memory_space<vmem>>, vector<16x128xf32>
    %cst_3 = arith.constant dense<0.000000e+00> : vector<128xf32>
    %4 = vector.multi_reduction <add>, %3, %cst_3 [0] : vector<16x128xf32> to vector<128xf32>
    %5 = vector.shape_cast %4 : vector<128xf32> to vector<1x128xf32>
    %cst_4 = arith.constant 7.812500e-03 : f32
    %6 = vector.broadcast %cst_4 : f32 to vector<1x128xf32>
    %7 = arith.mulf %2, %6 : vector<1x128xf32>
    %cst_5 = arith.constant 7.812500e-03 : f32
    %8 = vector.broadcast %cst_5 : f32 to vector<1x128xf32>
    %9 = arith.mulf %5, %8 : vector<1x128xf32>
    %10 = arith.mulf %7, %7 : vector<1x128xf32>
    %11 = arith.subf %9, %10 : vector<1x128xf32>
    %cst_6 = arith.constant 0.000000e+00 : f32
    %12 = vector.broadcast %cst_6 : f32 to vector<1x128xf32>
    %13 = arith.maximumf %11, %12 : vector<1x128xf32>
    %c0_7 = arith.constant 0 : index
    %c0_8 = arith.constant 0 : index
    %14 = vector.load %arg4[%c0_7, %c0_8] : memref<1x128xf32, #tpu.memory_space<vmem>>, vector<1x128xf32>
    %cst_9 = arith.constant 9.99999974E-6 : f32
    %15 = vector.broadcast %cst_9 : f32 to vector<1x128xf32>
    %16 = arith.addf %13, %15 : vector<1x128xf32>
    %17 = math.rsqrt %16 : vector<1x128xf32>
    %18 = arith.mulf %14, %17 : vector<1x128xf32>
    %c0_10 = arith.constant 0 : index
    %c0_11 = arith.constant 0 : index
    %19 = vector.load %arg5[%c0_10, %c0_11] : memref<1x128xf32, #tpu.memory_space<vmem>>, vector<1x128xf32>
    %20 = arith.mulf %7, %18 : vector<1x128xf32>
    %21 = arith.subf %19, %20 : vector<1x128xf32>
    %c0_12 = arith.constant 0 : index
    %c0_13 = arith.constant 0 : index
    %22 = vector.load %arg1[%c0_12, %c0_13] : memref<64x128xbf16, #tpu.memory_space<vmem>>, vector<64x128xbf16>
    %23 = arith.extf %22 : vector<64x128xbf16> to vector<64x128xf32>
    %24 = vector.broadcast %18 : vector<1x128xf32> to vector<64x128xf32>
    %25 = arith.mulf %23, %24 : vector<64x128xf32>
    %26 = vector.broadcast %21 : vector<1x128xf32> to vector<64x128xf32>
    %27 = arith.addf %25, %26 : vector<64x128xf32>
    %cst_14 = arith.constant 1.000000e-01 : f32
    %28 = vector.broadcast %cst_14 : f32 to vector<64x128xf32>
    %29 = arith.mulf %28, %27 : vector<64x128xf32>
    %30 = arith.maximumf %27, %29 : vector<64x128xf32>
    %31 = arith.truncf %30 : vector<64x128xf32> to vector<64x128xbf16>
    %c0_15 = arith.constant 0 : index
    %c0_16 = arith.constant 0 : index
    %32 = vector.load %arg6[%c0_15, %c0_16] : memref<128x128xbf16, #tpu.memory_space<vmem>>, vector<128x128xbf16>
    %cst_17 = arith.constant dense<0.000000e+00> : vector<64x128xf32>
    %33 = tpu.matmul %31, %32, %cst_17 {dimension_numbers = #tpu.dot_dimension_numbers<[1], [0], [0], [1], [0, 0, 1, 1], [], []>} : vector<64x128xbf16>, vector<128x128xbf16>, vector<64x128xf32> -> vector<64x128xf32>
    %c0_18 = arith.constant 0 : index
    %c0_19 = arith.constant 0 : index
    %34 = vector.load %arg7[%c0_18, %c0_19] : memref<1x128xf32, #tpu.memory_space<vmem>>, vector<1x128xf32>
    %35 = vector.broadcast %34 : vector<1x128xf32> to vector<64x128xf32>
    %36 = arith.addf %33, %35 : vector<64x128xf32>
    %37 = arith.truncf %36 : vector<64x128xf32> to vector<64x128xbf16>
    %c0_20 = arith.constant 0 : index
    %c0_21 = arith.constant 0 : index
    %38 = vector.load %arg8[%c0_20, %c0_21] : memref<64x128xbf16, #tpu.memory_space<vmem>>, vector<64x128xbf16>
    tpu.vector_store %arg8[%c0_20, %c0_21], %37 {strides = array<i32>} : memref<64x128xbf16, #tpu.memory_space<vmem>>, vector<64x128xbf16>,
    return
  }
  func.func @transform_0(%arg0: i32) -> (i32, i32) {
    %c0_i32 = arith.constant 0 : i32
    %c0_i32_0 = arith.constant 0 : i32
    return %arg0, %c0_i32 : i32, i32
  }
  func.func @transform_1(%arg0: i32) -> (i32, i32) {
    %c0_i32 = arith.constant 0 : i32
    %c0_i32_0 = arith.constant 0 : i32
    %c0_i32_1 = arith.constant 0 : i32
    return %c0_i32, %c0_i32_0 : i32, i32
  }
  func.func @transform_2(%arg0: i32) -> (i32, i32) {
    %c0_i32 = arith.constant 0 : i32
    %c0_i32_0 = arith.constant 0 : i32
    %c0_i32_1 = arith.constant 0 : i32
    return %c0_i32, %c0_i32_0 : i32, i32
  }
  func.func @transform_3(%arg0: i32) -> (i32, i32) {
    %c0_i32 = arith.constant 0 : i32
    %c0_i32_0 = arith.constant 0 : i32
    %c0_i32_1 = arith.constant 0 : i32
    return %c0_i32, %c0_i32_0 : i32, i32
  }
  func.func @transform_4(%arg0: i32) -> (i32, i32) {
    %c0_i32 = arith.constant 0 : i32
    %c0_i32_0 = arith.constant 0 : i32
    %c0_i32_1 = arith.constant 0 : i32
    return %c0_i32, %c0_i32_0 : i32, i32
  }
  func.func @transform_5(%arg0: i32) -> (i32, i32) {
    %c0_i32 = arith.constant 0 : i32
    %c0_i32_0 = arith.constant 0 : i32
    %c0_i32_1 = arith.constant 0 : i32
    return %c0_i32, %c0_i32_0 : i32, i32
  }
  func.func @transform_6(%arg0: i32) -> (i32, i32) {
    %c0_i32 = arith.constant 0 : i32
    %c0_i32_0 = arith.constant 0 : i32
    %c0_i32_1 = arith.constant 0 : i32
    return %c0_i32, %c0_i32_0 : i32, i32
  }
  func.func @transform_7(%arg0: i32) -> (i32, i32) {
    %c0_i32 = arith.constant 0 : i32
    %c0_i32_0 = arith.constant 0 : i32
    return %arg0, %c0_i32 : i32, i32
  }
}

</mosaic_0001>

<bundles_post_ra>
// kernel: scale_prediction.2
= control target key start
LH: loop header
LB: loop body
LE: loop exit
PB: predicated region body
PF: predicated region fallthrough
CT: control target
= control target key end

     0   :  { %s706_s15 = smov 0   ;;  %s708_s16 = smov 0   ;;  %s774_s0 = inlined_call_operand.vmem [shape: bf16[128,72], index: 0, kind: input, shape index: {}]   ;;  %s775_s1 = inlined_call_operand.vmem [shape: bf16[72,128], index: 1, kind: input, shape index: {}]   ;;  %s776_s2 = inlined_call_operand.vmem [shape: bf16[128,128], index: 2, kind: output, shape index: {0}]   ;;  %s777_s3 = inlined_call_operand.vmem [shape: f32[16,128], index: 3, kind: output, shape index: {1}]   ;;  %s778_s4 = inlined_call_operand.vmem [shape: f32[16,128], index: 4, kind: output, shape index: {2}]  }
   0x1   :  { %s710_s17 = smov 0  }
   0x2 LB: > { %s27_s18 = sadd.s32 1, %s675_s16  ;;  %p541_p0 = scmp.ge.s32.totalorder %s679_s17, 1  ;;  %s679_s17 = sphi %s710_s17, %s15_s17   ;;  %s675_s16 = sphi %s708_s16, %s780_s16   ;;  %s671_s15 = sphi %s706_s15, %s779_s15  }
   0x3   : > { %p29_p1 = scmp.ge.s32.totalorder %s27_s18, 2  ;;  %p186_p2 = scmp.lt.s32.totalorder %s679_s17, 3 }
   0x5   : > { %s782_s18 = smov (%p29_p1, %s27_s18), 0  ;;  %p187_p3 = pnand %p541_p0, %p186_p2 }
   0x6   : > { %s542_s21 = sshll.u32 (!%p187_p3), %s671_s15, 3  ;;  %p238_p5 = scmp.lt.s32.totalorder (!%p187_p3), %s671_s15, 1 }
   0x7   : > { %190 = sbr.rel (%p187_p3) target bundleno = 188 (0xbc), region = 28  ;;  %p224_p4 = scmp.lt.s32.totalorder (!%p187_p3), %s542_s21, 15 }
   0xc   : > { %v269_v0 = vld [vmem:[%s775_s1 + $0x20] sm:$0xf]  ;;  %vm330_vm0 = vcmask 1043456   ;;  %v593_v4 = vld [vmem:[%s775_s1 + $0x18] sm:$0xff]  ;;  %v592_v5 = vld [vmem:[%s775_s1 + $0x10] sm:$0xff]  ;;  %s784_s21 = smov (!%p224_p4, %s542_s21), 15 }
   0xd   : > { %v307_v1 = vunpack.c.l.b16 %v269_v0  ;;  %v591_v6 = vld [vmem:[%s775_s1 + $0x8] sm:$0xff]  ;;  %s543_s28 = sshll.u32 %s784_s21, 2  ;;  %v590_v7 = vld [vmem:[%s775_s1] sm:$0xff]  ;;  %vm317_vm1 = vcmask 588800   ;;  %s786_s15 = smov (!%p238_p5, %s671_s15), 1 }
   0xe   : > { %s227_s7 = scalar_lea.vmem %s774_s0, %s543_s28  ;;  %s751_s10 = scalar_lea.vmem %s776_s2, %s543_s28 }
   0xf   : > { %v312_v2 = vpack.c.b16 %v307_v1, %v307_v1  ;;  %v586_v8 = vld [vmem:[%s227_s7] sm:$0xff]  ;;  %v587_v9 = vld [vmem:[%s227_s7 + $0x8] sm:$0xff]  ;;  %v588_v10 = vld [vmem:[%s227_s7 + $0x10] sm:$0xff]  ;;  %s546_s11 = sshll.u32 %s786_s15, 3 }
  0x10   : > { %v589_v11 = vld [vmem:[%s227_s7 + $0x18] sm:$0xff]  ;;  %s241_s14 = scalar_lea.vmem %s777_s3, %s546_s11  ;;  %s245_s21 = scalar_lea.vmem %s778_s4, %s546_s11 }
  0x11   : > { %v332_v3 = vsel %vm330_vm0, %v312_v2, 0 }
  0x12   : > { %337 = vmatpush.bf16.msra.mxu0 %v332_v3  ;;  %617 = vmatpush.bf16.msra.mxu1 %v332_v3 }
  0x13   : > { %618 = vmatpush.bf16.msra.mxu2 %v332_v3  ;;  %619 = vmatpush.bf16.msra.mxu3 %v332_v3 }
  0x16   : > { %338 = vmatpush.bf16.msra.mxu0 %v593_v4  ;;  %620 = vmatpush.bf16.msra.mxu1 %v593_v4 }
  0x17   : > { %621 = vmatpush.bf16.msra.mxu2 %v593_v4  ;;  %622 = vmatpush.bf16.msra.mxu3 %v593_v4 }
  0x1a   : > { %339 = vmatpush.bf16.msra.mxu0 %v592_v5  ;;  %623 = vmatpush.bf16.msra.mxu1 %v592_v5 }
  0x1b   : > { %624 = vmatpush.bf16.msra.mxu2 %v592_v5  ;;  %625 = vmatpush.bf16.msra.mxu3 %v592_v5 }
  0x1e   : > { %340 = vmatpush.bf16.msra.mxu0 %v591_v6  ;;  %626 = vmatpush.bf16.msra.mxu1 %v591_v6 }
  0x1f   : > { %627 = vmatpush.bf16.msra.mxu2 %v591_v6  ;;  %628 = vmatpush.bf16.msra.mxu3 %v591_v6 }
  0x22   : > { %341 = vmatpush.bf16.msra.mxu0 %v590_v7  ;;  %629 = vmatpush.bf16.msra.mxu1 %v590_v7 }
  0x23   : > { %630 = vmatpush.bf16.msra.mxu2 %v590_v7  ;;  %631 = vmatpush.bf16.msra.mxu3 %v590_v7 }
  0x25   : > { %580 = vmatmul.msk.bf16.vlgmr.msra.gmra.mxu0 %vm317_vm1, %v586_v8  ;;  %581 = vmatmul.msk.bf16.vlgmr.msra.gmra.mxu1 %vm317_vm1, %v587_v9 }
  0x26   : > { %582 = vmatmul.msk.bf16.vlgmr.msra.gmra.mxu2 %vm317_vm1, %v588_v10  ;;  %583 = vmatmul.msk.bf16.vlgmr.msra.gmra.mxu3 %vm317_vm1, %v589_v11 }
  0xa2   : > { %v343_v12 = vpop.f32.mrf.mxu0  ;;  %v348_v13 = vpop.f32.mrf.mxu1 }
  0xa3   : > { %v390_v16 = vmul.f32 %v343_v12, %v343_v12  ;;  %v392_v23 = vmul.f32 %v348_v13, %v348_v13 }
  0xa9   : > { %v353_v14 = vpop.f32.mrf.mxu2  ;;  %v358_v15 = vpop.f32.mrf.mxu3 }
  0xaa   : > { %v345_v17 = vpop.f32.mrf.mxu0  ;;  %v350_v18 = vpop.f32.mrf.mxu1  ;;  %v394_v29 = vmul.f32 %v353_v14, %v353_v14  ;;  %v396_v39 = vmul.f32 %v358_v15, %v358_v15 }
  0xab   : > { %v597_v19 = vpack.c.bf16 %v345_v17, %v343_v12  ;;  %v380_v20 = vadd.f32 %v345_v17, %v343_v12  ;;  %v391_v21 = vmul.f32 %v345_v17, %v345_v17  ;;  %v602_v22 = vpack.c.bf16 %v350_v18, %v348_v13 }
  0xac   : > { %v393_v27 = vmul.f32 %v350_v18, %v350_v18 }
  0xad   : > { %598 = vst [vmem:[%s751_s10] sm:$0xff] %v597_v19   ;;  %v398_v24 = vadd.f32 %v391_v21, %v390_v16  ;;  %v381_v25 = vadd.f32 %v380_v20, %v348_v13 }
  0xae   : > { %614 = vst [vmem:[%s751_s10 + $0x8] sm:$0xff] %v602_v22  }
  0xaf   : > { %v382_v26 = vadd.f32 %v381_v25, %v350_v18  ;;  %v399_v28 = vadd.f32 %v398_v24, %v392_v23 }
  0xb1   : > { %v400_v30 = vadd.f32 %v399_v28, %v393_v27  ;;  %v355_v31 = vpop.f32.mrf.mxu2  ;;  %v383_v32 = vadd.f32 %v382_v26, %v353_v14  ;;  %v360_v33 = vpop.f32.mrf.mxu3 }
  0xb2   : > { %v607_v34 = vpack.c.bf16 %v355_v31, %v353_v14  ;;  %v612_v35 = vpack.c.bf16 %v360_v33, %v358_v15  ;;  %v395_v37 = vmul.f32 %v355_v31, %v355_v31  ;;  %v397_v43 = vmul.f32 %v360_v33, %v360_v33 }
  0xb3   : > { %v384_v36 = vadd.f32 %v383_v32, %v355_v31  ;;  %v401_v38 = vadd.f32 %v400_v30, %v394_v29 }
  0xb4   : > { %615 = vst [vmem:[%s751_s10 + $0x10] sm:$0xff] %v607_v34  }
  0xb5   : > { %v402_v40 = vadd.f32 %v401_v38, %v395_v37  ;;  %616 = vst [vmem:[%s751_s10 + $0x18] sm:$0xff] %v612_v35   ;;  %v385_v41 = vadd.f32 %v384_v36, %v358_v15 }
  0xb7   : > { %v386_v42 = vadd.f32 %v385_v41, %v360_v33  ;;  %v403_v44 = vadd.f32 %v402_v40, %v396_v39 }
  0xb9   : > { %v404_v45 = vadd.f32 %v403_v44, %v397_v43  ;;  %388 = vst [vmem:[%s241_s14] sm:$0xff] %v386_v42 }
  0xbb   : > { %406 = vst [vmem:[%s245_s21] sm:$0xff] %v404_v45 }
  0xbc PF: > { %s15_s17 = sadd.s32 1, %s679_s17   ;;  %s779_s15 = smov %s675_s16 }
  0xbd   : > { %p12_p6 = scmp.ge.s32.totalorder %s15_s17, 4   ;;  %s780_s16 = smov %s782_s18 }
  0xbf   :  { %14 = sbr.rel (!%p12_p6) target bundleno = 2 (0x2), region = 86 }

// kernel: scale_prediction.3
= control target key start
LH: loop header
LB: loop body
LE: loop exit
PB: predicated region body
PF: predicated region fallthrough
CT: control target
= control target key end

     0   :  { %s724_s24 = smov 0   ;;  %s795_s0 = inlined_call_operand.vmem [shape: bf16[128,128], index: 0, kind: input, shape index: {}]   ;;  %s796_s1 = inlined_call_operand.vmem [shape: f32[16,128], index: 1, kind: input, shape index: {}]   ;;  %s797_s2 = inlined_call_operand.vmem [shape: f32[16,128], index: 2, kind: input, shape index: {}]   ;;  %s798_s3 = inlined_call_operand.vmem [shape: f32[1,128], index: 3, kind: input, shape index: {}]   ;;  %s799_s4 = inlined_call_operand.vmem [shape: f32[1,128], index: 4, kind: input, shape index: {}]   ;;  %s800_s5 = inlined_call_operand.vmem [shape: bf16[128,128], index: 5, kind: input, shape index: {}]   ;;  %s801_s6 = inlined_call_operand.vmem [shape: f32[1,128], index: 6, kind: input, shape index: {}]   ;;  %s802_s7 = inlined_call_operand.vmem [shape: bf16[128,128], index: 7, kind: output, shape index: {}]  }
   0x1 LB: > { %s548_s25 = sadd.s32 4294967295, %s682_s24   ;;  %p552_p0 = scmp.ge.s32.totalorder %s682_s24, 1  ;;  %s682_s24 = sphi %s724_s24, %s17_s24  }
   0x2   : > { %p238_p1 = scmp.lt.s32.totalorder %s682_s24, 3 }
   0x4   : > { %p239_p2 = pnand %p552_p0, %p238_p1 }
   0x5   : > { %s553_s29 = sshll.u32 (!%p239_p2), %s548_s25, 3 }
   0x6   : > { %242 = sbr.rel (%p239_p2) target bundleno = 219 (0xdb), region = 48  ;;  %p271_p3 = scmp.lt.s32.totalorder (!%p239_p2), %s553_s29, 15 }
   0xb   : > { %v598_v0 = vld [vmem:[%s800_s5 + $0x38] sm:$0xff]  ;;  %v597_v1 = vld [vmem:[%s800_s5 + $0x30] sm:$0xff]  ;;  %v282_v2 = vld [vmem:[%s796_s1] sm:$0xff]  ;;  %s804_s29 = smov (!%p271_p3, %s553_s29), 15 }
   0xc   : > { %447 = vmatpush.bf16.msra.mxu0 %v598_v0  ;;  %641 = vmatpush.bf16.msra.mxu1 %v598_v0  ;;  %v283_v3 = vld [vmem:[%s796_s1 + $0x8] sm:$0xff]  ;;  %v291_v4 = vld [vmem:[%s797_s2] sm:$0xff]  ;;  %v594_v18 = vld [vmem:[%s800_s5 + $0x18] sm:$0xff]  ;;  %s554_s30 = sshll.u32 %s804_s29, 2 }
   0xd   : > { %642 = vmatpush.bf16.msra.mxu2 %v598_v0  ;;  %643 = vmatpush.bf16.msra.mxu3 %v598_v0  ;;  %v292_v5 = vld [vmem:[%s797_s2 + $0x8] sm:$0xff]  ;;  %v284_v6 = vadd.f32 %v283_v3, %v282_v2  ;;  %v595_v13 = vld [vmem:[%s800_s5 + $0x20] sm:$0xff]  ;;  %v593_v23 = vld [vmem:[%s800_s5 + $0x10] sm:$0xff]  ;;  %s274_s9 = scalar_lea.vmem %s795_s0, %s554_s30  ;;  %s280_s18 = scalar_lea.vmem %s802_s7, %s554_s30 }
   0xe   : > { %v293_v7 = vadd.f32 %v292_v5, %v291_v4  ;;  %v596_v8 = vld [vmem:[%s800_s5 + $0x28] sm:$0xff]  ;;  %v591_v30 = vld [vmem:[%s800_s5] sm:$0xff]  ;;  %v636_v41 = vld [vmem:[%s274_s9 + $0x10] sm:$0xff]  }
   0xf   : > { %v285_v9 = vrot.slane %v284_v6, 4  ;;  %v592_v27 = vld [vmem:[%s800_s5 + $0x8] sm:$0xff]  ;;  %v305_v37 = vld [vmem:[%s798_s3] sm:$0x1]  ;;  %v637_v42 = vld [vmem:[%s274_s9 + $0x18] sm:$0xff]   ;;  %v609_v50 = vunpack.c.l.bf16 %v636_v41  ;;  %v610_v51 = vunpack.c.h.bf16 %v636_v41 }
  0x10   : > { %448 = vmatpush.bf16.msra.mxu0 %v597_v1  ;;  %644 = vmatpush.bf16.msra.mxu1 %v597_v1  ;;  %v294_v10 = vrot.slane %v293_v7, 4  ;;  %v600_v39 = vld [vmem:[%s274_s9] sm:$0xff]   ;;  %v635_v40 = vld [vmem:[%s274_s9 + $0x8] sm:$0xff]   ;;  %v613_v52 = vunpack.c.l.bf16 %v637_v42  ;;  %v614_v55 = vunpack.c.h.bf16 %v637_v42 }
  0x11   : > { %645 = vmatpush.bf16.msra.mxu2 %v597_v1  ;;  %646 = vmatpush.bf16.msra.mxu3 %v597_v1  ;;  %v286_v11 = vadd.f32 %v285_v9, %v284_v6  ;;  %v601_v45 = vunpack.c.l.bf16 %v600_v39  ;;  %v602_v46 = vunpack.c.h.bf16 %v600_v39  ;;  %v605_v47 = vunpack.c.l.bf16 %v635_v40  ;;  %v318_v48 = vld [vmem:[%s799_s4] sm:$0x1] }
  0x12   : > { %v295_v12 = vadd.f32 %v294_v10, %v293_v7  ;;  %v606_v49 = vunpack.c.h.bf16 %v635_v40 }
  0x13   : > { %v287_v14 = vrot.slane %v286_v11, 2 }
  0x14   : > { %449 = vmatpush.bf16.msra.mxu0 %v596_v8  ;;  %647 = vmatpush.bf16.msra.mxu1 %v596_v8  ;;  %v296_v15 = vrot.slane %v295_v12, 2 }
  0x15   : > { %648 = vmatpush.bf16.msra.mxu2 %v596_v8  ;;  %649 = vmatpush.bf16.msra.mxu3 %v596_v8  ;;  %v288_v16 = vadd.f32 %v287_v14, %v286_v11 }
  0x16   : > { %v297_v17 = vadd.f32 %v296_v15, %v295_v12 }
  0x17   : > { %v289_v19 = vrot.slane %v288_v16, 1 }
  0x18   : > { %450 = vmatpush.bf16.msra.mxu0 %v595_v13  ;;  %650 = vmatpush.bf16.msra.mxu1 %v595_v13  ;;  %v298_v20 = vrot.slane %v297_v17, 1 }
  0x19   : > { %651 = vmatpush.bf16.msra.mxu2 %v595_v13  ;;  %652 = vmatpush.bf16.msra.mxu3 %v595_v13  ;;  %v290_v21 = vadd.f32 %v289_v19, %v288_v16 }
  0x1a   : > { %v299_v22 = vadd.f32 %v298_v20, %v297_v17 }
  0x1b   : > { %v300_v24 = vmul.f32 0.0078125, %v290_v21 }
  0x1c   : > { %451 = vmatpush.bf16.msra.mxu0 %v594_v18  ;;  %653 = vmatpush.bf16.msra.mxu1 %v594_v18  ;;  %v301_v25 = vmul.f32 0.0078125, %v299_v22 }
  0x1d   : > { %654 = vmatpush.bf16.msra.mxu2 %v594_v18  ;;  %655 = vmatpush.bf16.msra.mxu3 %v594_v18  ;;  %v302_v26 = vmul.f32 %v300_v24, %v300_v24 }
  0x1f   : > { %v303_v28 = vsub.f32 %v301_v25, %v302_v26 }
  0x20   : > { %452 = vmatpush.bf16.msra.mxu0 %v593_v23  ;;  %656 = vmatpush.bf16.msra.mxu1 %v593_v23 }
  0x21   : > { %657 = vmatpush.bf16.msra.mxu2 %v593_v23  ;;  %658 = vmatpush.bf16.msra.mxu3 %v593_v23  ;;  %v304_v29 = vmax.f32 %v303_v28, 0.0 }
  0x23   : > { %v306_v31 = vadd.f32 1e-05, %v304_v29 }
  0x24   : > { %453 = vmatpush.bf16.msra.mxu0 %v592_v27  ;;  %659 = vmatpush.bf16.msra.mxu1 %v592_v27 }
  0x25   : > { %660 = vmatpush.bf16.msra.mxu2 %v592_v27  ;;  %661 = vmatpush.bf16.msra.mxu3 %v592_v27  ;;  %674 = vrsqrt.f32 %v306_v31  ;;  %vm313_vm0 = vweird.f32 %v306_v31 }
  0x28   : > { %454 = vmatpush.bf16.msra.mxu0 %v591_v30  ;;  %662 = vmatpush.bf16.msra.mxu1 %v591_v30 }
  0x29   : > { %663 = vmatpush.bf16.msra.mxu2 %v591_v30  ;;  %664 = vmatpush.bf16.msra.mxu3 %v591_v30 }
  0x2b   : > { %v675_v32 = vpop.eup %674 }
  0x2c   : > { %v308_v33 = vmul.f32 %v675_v32, %v306_v31  ;;  %vm314_vm1 = vweird.f32 %v675_v32 }
  0x2d   : > { %vm315_vm2 = vmor %vm313_vm0, %vm314_vm1 }
  0x2e   : > { %v309_v34 = vmul.f32 %v675_v32, %v308_v33 }
  0x30   : > { %v310_v35 = vmul.f32 0.5, %v309_v34 }
  0x32   : > { %v311_v36 = vsub.f32 1.5, %v310_v35 }
  0x34   : > { %v312_v38 = vmul.f32 %v675_v32, %v311_v36 }
  0x36   : > { %v316_v43 = vsel %vm315_vm2, %v675_v32, %v312_v38  ;;  %v673_v32 = vld [vmem:[%s801_s6] ss:$0 sm:$0xff] }
  0x37   : > { %v317_v44 = vmul.f32 %v316_v43, %v305_v37 }
  0x39   : > { %v319_v53 = vmul.f32 %v317_v44, %v300_v24  ;;  %v338_v54 = vperm.slane %v317_v44, 0 }
  0x3b   : > { %v320_v56 = vsub.f32 %v318_v48, %v319_v53  ;;  %v340_v57 = vmul.f32 %v601_v45, %v338_v54  ;;  %v341_v58 = vmul.f32 %v602_v46, %v338_v54  ;;  %v342_v59 = vmul.f32 %v605_v47, %v338_v54 }
  0x3c   : > { %v343_v60 = vmul.f32 %v606_v49, %v338_v54  ;;  %v344_v61 = vmul.f32 %v609_v50, %v338_v54  ;;  %v345_v62 = vmul.f32 %v610_v51, %v338_v54  ;;  %v346_v63 = vmul.f32 %v613_v52, %v338_v54 }
  0x3d   : > { %v349_v0 = vperm.slane %v320_v56, 0  ;;  %v347_v1 = vmul.f32 %v614_v55, %v338_v54 }
  0x3f   : > { %v351_v2 = vadd.f32 %v349_v0, %v340_v57  ;;  %v352_v3 = vadd.f32 %v349_v0, %v341_v58  ;;  %v353_v4 = vadd.f32 %v349_v0, %v342_v59  ;;  %v354_v5 = vadd.f32 %v349_v0, %v343_v60 }
  0x40   : > { %v355_v6 = vadd.f32 %v349_v0, %v344_v61  ;;  %v356_v7 = vadd.f32 %v349_v0, %v345_v62  ;;  %v357_v8 = vadd.f32 %v349_v0, %v346_v63  ;;  %v358_v9 = vadd.f32 %v349_v0, %v347_v1 }
  0x41   : > { %v359_v10 = vmul.f32 0.1, %v351_v2  ;;  %v360_v11 = vmul.f32 0.1, %v352_v3  ;;  %v361_v12 = vmul.f32 0.1, %v353_v4 }
  0x42   : > { %v362_v13 = vmul.f32 0.1, %v354_v5  ;;  %v363_v14 = vmul.f32 0.1, %v355_v6  ;;  %v364_v15 = vmul.f32 0.1, %v356_v7 }
  0x43   : > { %v367_v16 = vmax.f32 %v351_v2, %v359_v10  ;;  %v368_v17 = vmax.f32 %v352_v3, %v360_v11  ;;  %v369_v18 = vmax.f32 %v353_v4, %v361_v12  ;;  %v365_v19 = vmul.f32 0.1, %v357_v8 }
  0x44   : > { %v370_v20 = vmax.f32 %v354_v5, %v362_v13  ;;  %v371_v21 = vmax.f32 %v355_v6, %v363_v14  ;;  %v372_v22 = vmax.f32 %v356_v7, %v364_v15  ;;  %v366_v23 = vmul.f32 0.1, %v358_v9 }
  0x45   : > { %v375_v24 = vpack.c.bf16 %v368_v17, %v367_v16  ;;  %v373_v25 = vmax.f32 %v357_v8, %v365_v19 }
  0x46   : > { %v376_v26 = vpack.c.bf16 %v370_v20, %v369_v18  ;;  %v377_v27 = vpack.c.bf16 %v372_v22, %v371_v21  ;;  %v374_v28 = vmax.f32 %v358_v9, %v366_v23 }
  0x47   : > { %455 = vmatmul.bf16.vlgmr.msra.gmra.mxu0 %v375_v24 }
  0x48   : > { %460 = vmatmul.bf16.vlgmr.msra.gmra.mxu1 %v376_v26  ;;  %465 = vmatmul.bf16.vlgmr.msra.gmra.mxu2 %v377_v27  ;;  %v378_v29 = vpack.c.bf16 %v374_v28, %v373_v25 }
  0x4a   : > { %470 = vmatmul.bf16.vlgmr.msra.gmra.mxu3 %v378_v29 }
  0xc4   : > { %v456_v30 = vpop.f32.mrf.mxu0 }
  0xc5   : > { %v461_v31 = vpop.f32.mrf.mxu1  ;;  %v457_v35 = vadd.f32 %v673_v32, %v456_v30 }
  0xc6   : > { %v462_v39 = vadd.f32 %v673_v32, %v461_v31 }
  0xcb   : > { %v466_v33 = vpop.f32.mrf.mxu2 }
  0xcc   : > { %v458_v34 = vpop.f32.mrf.mxu0  ;;  %v467_v44 = vadd.f32 %v673_v32, %v466_v33 }
  0xcd   : > { %v471_v36 = vpop.f32.mrf.mxu3  ;;  %v459_v37 = vadd.f32 %v673_v32, %v458_v34  ;;  %v463_v38 = vpop.f32.mrf.mxu1 }
  0xce   : > { %v464_v40 = vadd.f32 %v673_v32, %v463_v38  ;;  %v472_v47 = vadd.f32 %v673_v32, %v471_v36 }
  0xcf   : > { %v618_v41 = vpack.c.bf16 %v459_v37, %v457_v35 }
  0xd0   : > { %v623_v42 = vpack.c.bf16 %v464_v40, %v462_v39 }
  0xd1   : > { %619 = vst [vmem:[%s280_s18] sm:$0xff] %v618_v41  }
  0xd2   : > { %638 = vst [vmem:[%s280_s18 + $0x8] sm:$0xff] %v623_v42  }
  0xd3   : > { %v468_v43 = vpop.f32.mrf.mxu2 }
  0xd4   : > { %v469_v45 = vadd.f32 %v673_v32, %v468_v43 }
  0xd5   : > { %v473_v46 = vpop.f32.mrf.mxu3 }
  0xd6   : > { %v628_v48 = vpack.c.bf16 %v469_v45, %v467_v44  ;;  %v474_v49 = vadd.f32 %v673_v32, %v473_v46 }
  0xd8   : > { %639 = vst [vmem:[%s280_s18 + $0x10] sm:$0xff] %v628_v48   ;;  %v633_v50 = vpack.c.bf16 %v474_v49, %v472_v47 }
  0xda   : > { %640 = vst [vmem:[%s280_s18 + $0x18] sm:$0xff] %v633_v50  }
  0xdb PF: > { %s17_s24 = sadd.s32 1, %s682_s24  }
  0xdc   : > { %p14_p4 = scmp.ge.s32.totalorder %s17_s24, 4  }
  0xde   :  { %16 = sbr.rel (!%p14_p4) target bundleno = 1 (0x1), region = 78 }

// kernel: scale_prediction.2
= control target key start
LH: loop header
LB: loop body
LE: loop exit
PB: predicated region body
PF: predicated region fallthrough
CT: control target
= control target key end

     0   :  { %s706_s15 = smov 0   ;;  %s708_s16 = smov 0   ;;  %s774_s0 = inlined_call_operand.vmem [shape: bf16[128,72], index: 0, kind: input, shape index: {}]   ;;  %s775_s1 = inlined_call_operand.vmem [shape: bf16[72,128], index: 1, kind: input, shape index: {}]   ;;  %s776_s2 = inlined_call_operand.vmem [shape: bf16[128,128], index: 2, kind: output, shape index: {0}]   ;;  %s777_s3 = inlined_call_operand.vmem [shape: f32[16,128], index: 3, kind: output, shape index: {1}]   ;;  %s778_s4 = inlined_call_operand.vmem [shape: f32[16,128], index: 4, kind: output, shape index: {2}]  }
   0x1   :  { %s710_s17 = smov 0  }
   0x2 LB: > { %s27_s18 = sadd.s32 1, %s675_s16  ;;  %p541_p0 = scmp.ge.s32.totalorder %s679_s17, 1  ;;  %s679_s17 = sphi %s710_s17, %s15_s17   ;;  %s675_s16 = sphi %s708_s16, %s780_s16   ;;  %s671_s15 = sphi %s706_s15, %s779_s15  }
   0x3   : > { %p29_p1 = scmp.ge.s32.totalorder %s27_s18, 2  ;;  %p186_p2 = scmp.lt.s32.totalorder %s679_s17, 3 }
   0x5   : > { %s782_s18 = smov (%p29_p1, %s27_s18), 0  ;;  %p187_p3 = pnand %p541_p0, %p186_p2 }
   0x6   : > { %s542_s21 = sshll.u32 (!%p187_p3), %s671_s15, 3  ;;  %p238_p5 = scmp.lt.s32.totalorder (!%p187_p3), %s671_s15, 1 }
   0x7   : > { %190 = sbr.rel (%p187_p3) target bundleno = 188 (0xbc), region = 28  ;;  %p224_p4 = scmp.lt.s32.totalorder (!%p187_p3), %s542_s21, 15 }
   0xc   : > { %v269_v0 = vld [vmem:[%s775_s1 + $0x20] sm:$0xf]  ;;  %vm330_vm0 = vcmask 1043456   ;;  %v593_v4 = vld [vmem:[%s775_s1 + $0x18] sm:$0xff]  ;;  %v592_v5 = vld [vmem:[%s775_s1 + $0x10] sm:$0xff]  ;;  %s784_s21 = smov (!%p224_p4, %s542_s21), 15 }
   0xd   : > { %v307_v1 = vunpack.c.l.b16 %v269_v0  ;;  %v591_v6 = vld [vmem:[%s775_s1 + $0x8] sm:$0xff]  ;;  %s543_s28 = sshll.u32 %s784_s21, 2  ;;  %v590_v7 = vld [vmem:[%s775_s1] sm:$0xff]  ;;  %vm317_vm1 = vcmask 588800   ;;  %s786_s15 = smov (!%p238_p5, %s671_s15), 1 }
   0xe   : > { %s227_s7 = scalar_lea.vmem %s774_s0, %s543_s28  ;;  %s751_s10 = scalar_lea.vmem %s776_s2, %s543_s28 }
   0xf   : > { %v312_v2 = vpack.c.b16 %v307_v1, %v307_v1  ;;  %v586_v8 = vld [vmem:[%s227_s7] sm:$0xff]  ;;  %v587_v9 = vld [vmem:[%s227_s7 + $0x8] sm:$0xff]  ;;  %v588_v10 = vld [vmem:[%s227_s7 + $0x10] sm:$0xff]  ;;  %s546_s11 = sshll.u32 %s786_s15, 3 }
  0x10   : > { %v589_v11 = vld [vmem:[%s227_s7 + $0x18] sm:$0xff]  ;;  %s241_s14 = scalar_lea.vmem %s777_s3, %s546_s11  ;;  %s245_s21 = scalar_lea.vmem %s778_s4, %s546_s11 }
  0x11   : > { %v332_v3 = vsel %vm330_vm0, %v312_v2, 0 }
  0x12   : > { %337 = vmatpush.bf16.msra.mxu0 %v332_v3  ;;  %617 = vmatpush.bf16.msra.mxu1 %v332_v3 }
  0x13   : > { %618 = vmatpush.bf16.msra.mxu2 %v332_v3  ;;  %619 = vmatpush.bf16.msra.mxu3 %v332_v3 }
  0x16   : > { %338 = vmatpush.bf16.msra.mxu0 %v593_v4  ;;  %620 = vmatpush.bf16.msra.mxu1 %v593_v4 }
  0x17   : > { %621 = vmatpush.bf16.msra.mxu2 %v593_v4  ;;  %622 = vmatpush.bf16.msra.mxu3 %v593_v4 }
  0x1a   : > { %339 = vmatpush.bf16.msra.mxu0 %v592_v5  ;;  %623 = vmatpush.bf16.msra.mxu1 %v592_v5 }
  0x1b   : > { %624 = vmatpush.bf16.msra.mxu2 %v592_v5  ;;  %625 = vmatpush.bf16.msra.mxu3 %v592_v5 }
  0x1e   : > { %340 = vmatpush.bf16.msra.mxu0 %v591_v6  ;;  %626 = vmatpush.bf16.msra.mxu1 %v591_v6 }
  0x1f   : > { %627 = vmatpush.bf16.msra.mxu2 %v591_v6  ;;  %628 = vmatpush.bf16.msra.mxu3 %v591_v6 }
  0x22   : > { %341 = vmatpush.bf16.msra.mxu0 %v590_v7  ;;  %629 = vmatpush.bf16.msra.mxu1 %v590_v7 }
  0x23   : > { %630 = vmatpush.bf16.msra.mxu2 %v590_v7  ;;  %631 = vmatpush.bf16.msra.mxu3 %v590_v7 }
  0x25   : > { %580 = vmatmul.msk.bf16.vlgmr.msra.gmra.mxu0 %vm317_vm1, %v586_v8  ;;  %581 = vmatmul.msk.bf16.vlgmr.msra.gmra.mxu1 %vm317_vm1, %v587_v9 }
  0x26   : > { %582 = vmatmul.msk.bf16.vlgmr.msra.gmra.mxu2 %vm317_vm1, %v588_v10  ;;  %583 = vmatmul.msk.bf16.vlgmr.msra.gmra.mxu3 %vm317_vm1, %v589_v11 }
  0xa2   : > { %v343_v12 = vpop.f32.mrf.mxu0  ;;  %v348_v13 = vpop.f32.mrf.mxu1 }
  0xa3   : > { %v390_v16 = vmul.f32 %v343_v12, %v343_v12  ;;  %v392_v23 = vmul.f32 %v348_v13, %v348_v13 }
  0xa9   : > { %v353_v14 = vpop.f32.mrf.mxu2  ;;  %v358_v15 = vpop.f32.mrf.mxu3 }
  0xaa   : > { %v345_v17 = vpop.f32.mrf.mxu0  ;;  %v350_v18 = vpop.f32.mrf.mxu1  ;;  %v394_v29 = vmul.f32 %v353_v14, %v353_v14  ;;  %v396_v39 = vmul.f32 %v358_v15, %v358_v15 }
  0xab   : > { %v597_v19 = vpack.c.bf16 %v345_v17, %v343_v12  ;;  %v380_v20 = vadd.f32 %v345_v17, %v343_v12  ;;  %v391_v21 = vmul.f32 %v345_v17, %v345_v17  ;;  %v602_v22 = vpack.c.bf16 %v350_v18, %v348_v13 }
  0xac   : > { %v393_v27 = vmul.f32 %v350_v18, %v350_v18 }
  0xad   : > { %598 = vst [vmem:[%s751_s10] sm:$0xff] %v597_v19   ;;  %v398_v24 = vadd.f32 %v391_v21, %v390_v16  ;;  %v381_v25 = vadd.f32 %v380_v20, %v348_v13 }
  0xae   : > { %614 = vst [vmem:[%s751_s10 + $0x8] sm:$0xff] %v602_v22  }
  0xaf   : > { %v382_v26 = vadd.f32 %v381_v25, %v350_v18  ;;  %v399_v28 = vadd.f32 %v398_v24, %v392_v23 }
  0xb1   : > { %v400_v30 = vadd.f32 %v399_v28, %v393_v27  ;;  %v355_v31 = vpop.f32.mrf.mxu2  ;;  %v383_v32 = vadd.f32 %v382_v26, %v353_v14  ;;  %v360_v33 = vpop.f32.mrf.mxu3 }
  0xb2   : > { %v607_v34 = vpack.c.bf16 %v355_v31, %v353_v14  ;;  %v612_v35 = vpack.c.bf16 %v360_v33, %v358_v15  ;;  %v395_v37 = vmul.f32 %v355_v31, %v355_v31  ;;  %v397_v43 = vmul.f32 %v360_v33, %v360_v33 }
  0xb3   : > { %v384_v36 = vadd.f32 %v383_v32, %v355_v31  ;;  %v401_v38 = vadd.f32 %v400_v30, %v394_v29 }
  0xb4   : > { %615 = vst [vmem:[%s751_s10 + $0x10] sm:$0xff] %v607_v34  }
  0xb5   : > { %v402_v40 = vadd.f32 %v401_v38, %v395_v37  ;;  %616 = vst [vmem:[%s751_s10 + $0x18] sm:$0xff] %v612_v35   ;;  %v385_v41 = vadd.f32 %v384_v36, %v358_v15 }
  0xb7   : > { %v386_v42 = vadd.f32 %v385_v41, %v360_v33  ;;  %v403_v44 = vadd.f32 %v402_v40, %v396_v39 }
  0xb9   : > { %v404_v45 = vadd.f32 %v403_v44, %v397_v43  ;;  %388 = vst [vmem:[%s241_s14] sm:$0xff] %v386_v42 }
  0xbb   : > { %406 = vst [vmem:[%s245_s21] sm:$0xff] %v404_v45 }
  0xbc PF: > { %s15_s17 = sadd.s32 1, %s679_s17   ;;  %s779_s15 = smov %s675_s16 }
  0xbd   : > { %p12_p6 = scmp.ge.s32.totalorder %s15_s17, 4   ;;  %s780_s16 = smov %s782_s18 }
  0xbf   :  { %14 = sbr.rel (!%p12_p6) target bundleno = 2 (0x2), region = 86 }

// kernel: scale_prediction.3
= control target key start
LH: loop header
LB: loop body
LE: loop exit
PB: predicated region body
PF: predicated region fallthrough
CT: control target
= control target key end

     0   :  { %s724_s24 = smov 0   ;;  %s795_s0 = inlined_call_operand.vmem [shape: bf16[128,128], index: 0, kind: input, shape index: {}]   ;;  %s796_s1 = inlined_call_operand.vmem [shape: f32[16,128], index: 1, kind: input, shape index: {}]   ;;  %s797_s2 = inlined_call_operand.vmem [shape: f32[16,128], index: 2, kind: input, shape index: {}]   ;;  %s798_s3 = inlined_call_operand.vmem [shape: f32[1,128], index: 3, kind: input, shape index: {}]   ;;  %s799_s4 = inlined_call_operand.vmem [shape: f32[1,128], index: 4, kind: input, shape index: {}]   ;;  %s800_s5 = inlined_call_operand.vmem [shape: bf16[128,128], index: 5, kind: input, shape index: {}]   ;;  %s801_s6 = inlined_call_operand.vmem [shape: f32[1,128], index: 6, kind: input, shape index: {}]   ;;  %s802_s7 = inlined_call_operand.vmem [shape: bf16[128,128], index: 7, kind: output, shape index: {}]  }
   0x1 LB: > { %s548_s25 = sadd.s32 4294967295, %s682_s24   ;;  %p552_p0 = scmp.ge.s32.totalorder %s682_s24, 1  ;;  %s682_s24 = sphi %s724_s24, %s17_s24  }
   0x2   : > { %p238_p1 = scmp.lt.s32.totalorder %s682_s24, 3 }
   0x4   : > { %p239_p2 = pnand %p552_p0, %p238_p1 }
   0x5   : > { %s553_s29 = sshll.u32 (!%p239_p2), %s548_s25, 3 }
   0x6   : > { %242 = sbr.rel (%p239_p2) target bundleno = 219 (0xdb), region = 48  ;;  %p271_p3 = scmp.lt.s32.totalorder (!%p239_p2), %s553_s29, 15 }
   0xb   : > { %v598_v0 = vld [vmem:[%s800_s5 + $0x38] sm:$0xff]  ;;  %v597_v1 = vld [vmem:[%s800_s5 + $0x30] sm:$0xff]  ;;  %v282_v2 = vld [vmem:[%s796_s1] sm:$0xff]  ;;  %s804_s29 = smov (!%p271_p3, %s553_s29), 15 }
   0xc   : > { %447 = vmatpush.bf16.msra.mxu0 %v598_v0  ;;  %641 = vmatpush.bf16.msra.mxu1 %v598_v0  ;;  %v283_v3 = vld [vmem:[%s796_s1 + $0x8] sm:$0xff]  ;;  %v291_v4 = vld [vmem:[%s797_s2] sm:$0xff]  ;;  %v594_v18 = vld [vmem:[%s800_s5 + $0x18] sm:$0xff]  ;;  %s554_s30 = sshll.u32 %s804_s29, 2 }
   0xd   : > { %642 = vmatpush.bf16.msra.mxu2 %v598_v0  ;;  %643 = vmatpush.bf16.msra.mxu3 %v598_v0  ;;  %v292_v5 = vld [vmem:[%s797_s2 + $0x8] sm:$0xff]  ;;  %v284_v6 = vadd.f32 %v283_v3, %v282_v2  ;;  %v595_v13 = vld [vmem:[%s800_s5 + $0x20] sm:$0xff]  ;;  %v593_v23 = vld [vmem:[%s800_s5 + $0x10] sm:$0xff]  ;;  %s274_s9 = scalar_lea.vmem %s795_s0, %s554_s30  ;;  %s280_s18 = scalar_lea.vmem %s802_s7, %s554_s30 }
   0xe   : > { %v293_v7 = vadd.f32 %v292_v5, %v291_v4  ;;  %v596_v8 = vld [vmem:[%s800_s5 + $0x28] sm:$0xff]  ;;  %v591_v30 = vld [vmem:[%s800_s5] sm:$0xff]  ;;  %v636_v41 = vld [vmem:[%s274_s9 + $0x10] sm:$0xff]  }
   0xf   : > { %v285_v9 = vrot.slane %v284_v6, 4  ;;  %v592_v27 = vld [vmem:[%s800_s5 + $0x8] sm:$0xff]  ;;  %v305_v37 = vld [vmem:[%s798_s3] sm:$0x1]  ;;  %v637_v42 = vld [vmem:[%s274_s9 + $0x18] sm:$0xff]   ;;  %v609_v50 = vunpack.c.l.bf16 %v636_v41  ;;  %v610_v51 = vunpack.c.h.bf16 %v636_v41 }
  0x10   : > { %448 = vmatpush.bf16.msra.mxu0 %v597_v1  ;;  %644 = vmatpush.bf16.msra.mxu1 %v597_v1  ;;  %v294_v10 = vrot.slane %v293_v7, 4  ;;  %v600_v39 = vld [vmem:[%s274_s9] sm:$0xff]   ;;  %v635_v40 = vld [vmem:[%s274_s9 + $0x8] sm:$0xff]   ;;  %v613_v52 = vunpack.c.l.bf16 %v637_v42  ;;  %v614_v55 = vunpack.c.h.bf16 %v637_v42 }
  0x11   : > { %645 = vmatpush.bf16.msra.mxu2 %v597_v1  ;;  %646 = vmatpush.bf16.msra.mxu3 %v597_v1  ;;  %v286_v11 = vadd.f32 %v285_v9, %v284_v6  ;;  %v601_v45 = vunpack.c.l.bf16 %v600_v39  ;;  %v602_v46 = vunpack.c.h.bf16 %v600_v39  ;;  %v605_v47 = vunpack.c.l.bf16 %v635_v40  ;;  %v318_v48 = vld [vmem:[%s799_s4] sm:$0x1] }
  0x12   : > { %v295_v12 = vadd.f32 %v294_v10, %v293_v7  ;;  %v606_v49 = vunpack.c.h.bf16 %v635_v40 }
  0x13   : > { %v287_v14 = vrot.slane %v286_v11, 2 }
  0x14   : > { %449 = vmatpush.bf16.msra.mxu0 %v596_v8  ;;  %647 = vmatpush.bf16.msra.mxu1 %v596_v8  ;;  %v296_v15 = vrot.slane %v295_v12, 2 }
  0x15   : > { %648 = vmatpush.bf16.msra.mxu2 %v596_v8  ;;  %649 = vmatpush.bf16.msra.mxu3 %v596_v8  ;;  %v288_v16 = vadd.f32 %v287_v14, %v286_v11 }
  0x16   : > { %v297_v17 = vadd.f32 %v296_v15, %v295_v12 }
  0x17   : > { %v289_v19 = vrot.slane %v288_v16, 1 }
  0x18   : > { %450 = vmatpush.bf16.msra.mxu0 %v595_v13  ;;  %650 = vmatpush.bf16.msra.mxu1 %v595_v13  ;;  %v298_v20 = vrot.slane %v297_v17, 1 }
  0x19   : > { %651 = vmatpush.bf16.msra.mxu2 %v595_v13  ;;  %652 = vmatpush.bf16.msra.mxu3 %v595_v13  ;;  %v290_v21 = vadd.f32 %v289_v19, %v288_v16 }
  0x1a   : > { %v299_v22 = vadd.f32 %v298_v20, %v297_v17 }
  0x1b   : > { %v300_v24 = vmul.f32 0.0078125, %v290_v21 }
  0x1c   : > { %451 = vmatpush.bf16.msra.mxu0 %v594_v18  ;;  %653 = vmatpush.bf16.msra.mxu1 %v594_v18  ;;  %v301_v25 = vmul.f32 0.0078125, %v299_v22 }
  0x1d   : > { %654 = vmatpush.bf16.msra.mxu2 %v594_v18  ;;  %655 = vmatpush.bf16.msra.mxu3 %v594_v18  ;;  %v302_v26 = vmul.f32 %v300_v24, %v300_v24 }
  0x1f   : > { %v303_v28 = vsub.f32 %v301_v25, %v302_v26 }
  0x20   : > { %452 = vmatpush.bf16.msra.mxu0 %v593_v23  ;;  %656 = vmatpush.bf16.msra.mxu1 %v593_v23 }
  0x21   : > { %657 = vmatpush.bf16.msra.mxu2 %v593_v23  ;;  %658 = vmatpush.bf16.msra.mxu3 %v593_v23  ;;  %v304_v29 = vmax.f32 %v303_v28, 0.0 }
  0x23   : > { %v306_v31 = vadd.f32 1e-05, %v304_v29 }
  0x24   : > { %453 = vmatpush.bf16.msra.mxu0 %v592_v27  ;;  %659 = vmatpush.bf16.msra.mxu1 %v592_v27 }
  0x25   : > { %660 = vmatpush.bf16.msra.mxu2 %v592_v27  ;;  %661 = vmatpush.bf16.msra.mxu3 %v592_v27  ;;  %674 = vrsqrt.f32 %v306_v31  ;;  %vm313_vm0 = vweird.f32 %v306_v31 }
  0x28   : > { %454 = vmatpush.bf16.msra.mxu0 %v591_v30  ;;  %662 = vmatpush.bf16.msra.mxu1 %v591_v30 }
  0x29   : > { %663 = vmatpush.bf16.msra.mxu2 %v591_v30  ;;  %664 = vmatpush.bf16.msra.mxu3 %v591_v30 }
  0x2b   : > { %v675_v32 = vpop.eup %674 }
  0x2c   : > { %v308_v33 = vmul.f32 %v675_v32, %v306_v31  ;;  %vm314_vm1 = vweird.f32 %v675_v32 }
  0x2d   : > { %vm315_vm2 = vmor %vm313_vm0, %vm314_vm1 }
  0x2e   : > { %v309_v34 = vmul.f32 %v675_v32, %v308_v33 }
  0x30   : > { %v310_v35 = vmul.f32 0.5, %v309_v34 }
  0x32   : > { %v311_v36 = vsub.f32 1.5, %v310_v35 }
  0x34   : > { %v312_v38 = vmul.f32 %v675_v32, %v311_v36 }
  0x36   : > { %v316_v43 = vsel %vm315_vm2, %v675_v32, %v312_v38  ;;  %v673_v32 = vld [vmem:[%s801_s6] ss:$0 sm:$0xff] }
  0x37   : > { %v317_v44 = vmul.f32 %v316_v43, %v305_v37 }
  0x39   : > { %v319_v53 = vmul.f32 %v317_v44, %v300_v24  ;;  %v338_v54 = vperm.slane %v317_v44, 0 }
  0x3b   : > { %v320_v56 = vsub.f32 %v318_v48, %v319_v53  ;;  %v340_v57 = vmul.f32 %v601_v45, %v338_v54  ;;  %v341_v58 = vmul.f32 %v602_v46, %v338_v54  ;;  %v342_v59 = vmul.f32 %v605_v47, %v338_v54 }
  0x3c   : > { %v343_v60 = vmul.f32 %v606_v49, %v338_v54  ;;  %v344_v61 = vmul.f32 %v609_v50, %v338_v54  ;;  %v345_v62 = vmul.f32 %v610_v51, %v338_v54  ;;  %v346_v63 = vmul.f32 %v613_v52, %v338_v54 }
  0x3d   : > { %v349_v0 = vperm.slane %v320_v56, 0  ;;  %v347_v1 = vmul.f32 %v614_v55, %v338_v54 }
  0x3f   : > { %v351_v2 = vadd.f32 %v349_v0, %v340_v57  ;;  %v352_v3 = vadd.f32 %v349_v0, %v341_v58  ;;  %v353_v4 = vadd.f32 %v349_v0, %v342_v59  ;;  %v354_v5 = vadd.f32 %v349_v0, %v343_v60 }
  0x40   : > { %v355_v6 = vadd.f32 %v349_v0, %v344_v61  ;;  %v356_v7 = vadd.f32 %v349_v0, %v345_v62  ;;  %v357_v8 = vadd.f32 %v349_v0, %v346_v63  ;;  %v358_v9 = vadd.f32 %v349_v0, %v347_v1 }
  0x41   : > { %v359_v10 = vmul.f32 0.1, %v351_v2  ;;  %v360_v11 = vmul.f32 0.1, %v352_v3  ;;  %v361_v12 = vmul.f32 0.1, %v353_v4 }
  0x42   : > { %v362_v13 = vmul.f32 0.1, %v354_v5  ;;  %v363_v14 = vmul.f32 0.1, %v355_v6  ;;  %v364_v15 = vmul.f32 0.1, %v356_v7 }
  0x43   : > { %v367_v16 = vmax.f32 %v351_v2, %v359_v10  ;;  %v368_v17 = vmax.f32 %v352_v3, %v360_v11  ;;  %v369_v18 = vmax.f32 %v353_v4, %v361_v12  ;;  %v365_v19 = vmul.f32 0.1, %v357_v8 }
  0x44   : > { %v370_v20 = vmax.f32 %v354_v5, %v362_v13  ;;  %v371_v21 = vmax.f32 %v355_v6, %v363_v14  ;;  %v372_v22 = vmax.f32 %v356_v7, %v364_v15  ;;  %v366_v23 = vmul.f32 0.1, %v358_v9 }
  0x45   : > { %v375_v24 = vpack.c.bf16 %v368_v17, %v367_v16  ;;  %v373_v25 = vmax.f32 %v357_v8, %v365_v19 }
  0x46   : > { %v376_v26 = vpack.c.bf16 %v370_v20, %v369_v18  ;;  %v377_v27 = vpack.c.bf16 %v372_v22, %v371_v21  ;;  %v374_v28 = vmax.f32 %v358_v9, %v366_v23 }
  0x47   : > { %455 = vmatmul.bf16.vlgmr.msra.gmra.mxu0 %v375_v24 }
  0x48   : > { %460 = vmatmul.bf16.vlgmr.msra.gmra.mxu1 %v376_v26  ;;  %465 = vmatmul.bf16.vlgmr.msra.gmra.mxu2 %v377_v27  ;;  %v378_v29 = vpack.c.bf16 %v374_v28, %v373_v25 }
  0x4a   : > { %470 = vmatmul.bf16.vlgmr.msra.gmra.mxu3 %v378_v29 }
  0xc4   : > { %v456_v30 = vpop.f32.mrf.mxu0 }
  0xc5   : > { %v461_v31 = vpop.f32.mrf.mxu1  ;;  %v457_v35 = vadd.f32 %v673_v32, %v456_v30 }
  0xc6   : > { %v462_v39 = vadd.f32 %v673_v32, %v461_v31 }
  0xcb   : > { %v466_v33 = vpop.f32.mrf.mxu2 }
  0xcc   : > { %v458_v34 = vpop.f32.mrf.mxu0  ;;  %v467_v44 = vadd.f32 %v673_v32, %v466_v33 }
  0xcd   : > { %v471_v36 = vpop.f32.mrf.mxu3  ;;  %v459_v37 = vadd.f32 %v673_v32, %v458_v34  ;;  %v463_v38 = vpop.f32.mrf.mxu1 }
  0xce   : > { %v464_v40 = vadd.f32 %v673_v32, %v463_v38  ;;  %v472_v47 = vadd.f32 %v673_v32, %v471_v36 }
  0xcf   : > { %v618_v41 = vpack.c.bf16 %v459_v37, %v457_v35 }
  0xd0   : > { %v623_v42 = vpack.c.bf16 %v464_v40, %v462_v39 }
  0xd1   : > { %619 = vst [vmem:[%s280_s18] sm:$0xff] %v618_v41  }
  0xd2   : > { %638 = vst [vmem:[%s280_s18 + $0x8] sm:$0xff] %v623_v42  }
  0xd3   : > { %v468_v43 = vpop.f32.mrf.mxu2 }
  0xd4   : > { %v469_v45 = vadd.f32 %v673_v32, %v468_v43 }
  0xd5   : > { %v473_v46 = vpop.f32.mrf.mxu3 }
  0xd6   : > { %v628_v48 = vpack.c.bf16 %v469_v45, %v467_v44  ;;  %v474_v49 = vadd.f32 %v673_v32, %v473_v46 }
  0xd8   : > { %639 = vst [vmem:[%s280_s18 + $0x10] sm:$0xff] %v628_v48   ;;  %v633_v50 = vpack.c.bf16 %v474_v49, %v472_v47 }
  0xda   : > { %640 = vst [vmem:[%s280_s18 + $0x18] sm:$0xff] %v633_v50  }
  0xdb PF: > { %s17_s24 = sadd.s32 1, %s682_s24  }
  0xdc   : > { %p14_p4 = scmp.ge.s32.totalorder %s17_s24, 4  }
  0xde   :  { %16 = sbr.rel (!%p14_p4) target bundleno = 1 (0x1), region = 78 }

</bundles_post_ra>
